<compile_context>
chip_gen: v7x
topology: tpu7x:2x2x1
jax: 0.10.0
libtpu: 0.0.40
codegen_flags: <defaults>
</compile_context>

<pallas_src>
import functools
import math

import numpy as np
import jax
import jax.numpy as jnp
from jax.experimental import pallas as pl
from jax.experimental.pallas import tpu as pltpu

NEG_SLOPE = 0.2


class Opt:
    dsc_channels = 4
    dsc_layers = 2
    dsc_scales = (1, 2)
    dsc_norm = "none"       # identity norm
    dsc_activ = "lrelu"     # LeakyReLU(0.2)
    dsc_padding = "reflect"
    dsc_dropout = 0.0       # identity
    load_size = 16


# ----------------------------- static helpers ------------------------------ #
def _reflect(i, n):
    """PyTorch ReflectionPad2d index reflection (no edge repeat)."""
    if n == 1:
        return 0
    i = abs(int(i))
    period = 2 * n - 2
    i %= period
    return i if i < n else period - i


def _layer_cfgs(opt):
    """Static per-conv shape metadata for the trunk and the patch heads."""
    def cfg(cin, cout, k, s, p, hin, win, act):
        oh = (hin + 2 * p - k) // s + 1
        ow = (win + 2 * p - k) // s + 1
        return dict(cin=cin, cout=cout, k=k, s=s, p=p, hin=hin, win=win,
                    oh=oh, ow=ow, act=act)

    trunk = []
    h = w = opt.load_size
    c = opt.dsc_channels
    # _init_layer = [ReflectionPad2d(3), Conv2d(3, C, k=7, s=1)]   (no activ)
    trunk.append(cfg(3, c, 7, 1, 3, h, w, False))
    h, w = trunk[-1]["oh"], trunk[-1]["ow"]
    prev, factor = c, 1
    # DownSampleConv: pad(1) -> conv(k=4,s=2) -> norm(id) -> lrelu -> dropout(id)
    for _ in range(opt.dsc_layers):
        factor *= 2
        trunk.append(cfg(prev, c * factor, 4, 2, 1, h, w, True))
        h, w = trunk[-1]["oh"], trunk[-1]["ow"]
        prev = c * factor
    size = int(opt.load_size // factor) + 1
    # patch heads: Conv2d(C*factor, 1, k=size-scale) -> norm(1)(id) -> lrelu
    heads = [cfg(prev, 1, size - scale, 1, 0, h, w, True)
             for scale in opt.dsc_scales]
    return trunk, heads


def _pack_selectors(cfgs, ohmax, hmax):
    """Constant 0/1 vertical-tap row selectors R_di (reflection+stride folded)."""
    totk = sum(c["k"] for c in cfgs)
    r = np.zeros((totk, ohmax, hmax), np.float32)
    off = 0
    for c in cfgs:
        for di in range(c["k"]):
            for oy in range(c["oh"]):
                r[off + di, oy,
                  _reflect(c["s"] * oy + di - c["p"], c["hin"])] = 1.0
        off += c["k"]
    return jnp.asarray(r, dtype=jnp.bfloat16)


def _pack_weights(cfgs, weights, kmax, nmax):
    """Repack conv weights: for each vertical tap di build a dense
    (W_in*Cin, OW*Cout) matrix M_di with horizontal taps / stride / reflection
    folded into its columns.  Returns bf16 (sum_k, kmax, nmax) weights and
    f32 (n_layers, nmax) per-output-column biases (zero padded)."""
    m_blocks, b_rows = [], []
    for c, (w, b) in zip(cfgs, weights):
        k, s, p = c["k"], c["s"], c["p"]
        win, cin, ow, cout = c["win"], c["cin"], c["ow"], c["cout"]
        pmat = np.zeros((k, ow, win), np.float32)
        for dj in range(k):
            for ox in range(ow):
                pmat[dj, ox, _reflect(s * ox + dj - p, win)] = 1.0
        # M[di, w*Cin+ci, ox*Cout+co] = sum_dj pmat[dj,ox,w] * W[co,ci,di,dj]
        m = jnp.einsum("jxw,oidj->dwixo", jnp.asarray(pmat), w,
                       precision=jax.lax.Precision.HIGHEST)
        m = m.reshape(k, win * cin, ow * cout)
        m = jnp.pad(m, ((0, 0), (0, kmax - win * cin), (0, nmax - ow * cout)))
        m_blocks.append(m)
        brow = jnp.tile(b, ow)                                  # (ow*cout,)
        b_rows.append(jnp.pad(brow, (0, nmax - ow * cout)))
    m_all = jnp.concatenate(m_blocks, axis=0).astype(jnp.bfloat16)
    b_all = jnp.stack(b_rows, axis=0).astype(jnp.float32)
    return m_all, b_all


# ------------------------------ Pallas kernel ------------------------------ #
def _fused_disc_kernel(x_ref, m_ref, r_ref, b_ref, *out_refs,
                       trunk_cfgs, head_cfgs, neg_slope):
    nmax = m_ref.shape[2]

    def conv(a, c, tap_off, bias_row):
        oh, hin = c["oh"], c["hin"]
        kdim = c["win"] * c["cin"]
        ncol = c["ow"] * c["cout"]
        # avoid ultra-narrow MXU result tiles for the heads; padded cols are 0
        nc = ncol if ncol >= 8 else nmax
        acc = jnp.zeros((oh, nc), jnp.float32)
        for t in range(c["k"]):                    # fully unrolled, static
            sel = r_ref[tap_off + t, 0:oh, 0:hin]             # (oh, hin) bf16
            rows = jnp.dot(sel, a,                            # exact row gather
                           preferred_element_type=jnp.float32)
            rows = rows.astype(jnp.bfloat16)                  # (oh, kdim)
            wmat = m_ref[tap_off + t, 0:kdim, 0:nc]           # (kdim, nc) bf16
            acc = acc + jnp.dot(rows, wmat,
                                preferred_element_type=jnp.float32)
        acc = acc + b_ref[bias_row:bias_row + 1, 0:nc]
        if c["act"]:
            acc = jnp.where(acc > 0, acc, neg_slope * acc)    # LeakyReLU(0.2)
        if nc != ncol:
            acc = acc[:, 0:ncol]
        return acc

    a = x_ref[0]                       # (H, W*Cin) bf16 for this batch element
    tap_off = 0
    row = 0
    for c in trunk_cfgs:               # trunk: activations stay on-chip
        a = conv(a, c, tap_off, row).astype(jnp.bfloat16)
        tap_off += c["k"]
        row += 1
    for c, o_ref in zip(head_cfgs, out_refs):   # heads share the trunk output
        y = conv(a, c, tap_off, row)            # (oh, ow) since cout == 1
        o_ref[...] = y.reshape((1,) + y.shape).astype(o_ref.dtype)
        tap_off += c["k"]
        row += 1


# ------------------------------ forward wrapper ----------------------------- #
def base_patch_discriminator_forward(params, x, opt):
    """Mirrors BasePatchDiscriminator.forward: trunk then list of patch heads.
    x: (B, 3, H, W) NCHW float32; returns [(B, 1, oh_i, ow_i)] per dsc_scale."""
    trunk_cfgs, head_cfgs = _layer_cfgs(opt)
    all_cfgs = trunk_cfgs + head_cfgs
    kmax = max(c["win"] * c["cin"] for c in all_cfgs)
    nmax = max(c["ow"] * c["cout"] for c in all_cfgs)
    hmax = max(c["hin"] for c in all_cfgs)
    ohmax = max(c["oh"] for c in all_cfgs)
    totk = sum(c["k"] for c in all_cfgs)
    nrows = len(all_cfgs)

    weights = [params["init"]] + list(params["down"]) + list(params["heads"])
    m_all, b_all = _pack_weights(all_cfgs, weights, kmax, nmax)
    r_all = _pack_selectors(all_cfgs, ohmax, hmax)

    b, cin, h, w = x.shape
    # single NCHW -> (B, H, W*C) conversion at the public boundary
    x2d = jnp.transpose(x, (0, 2, 3, 1)).reshape(b, h, w * cin)
    x2d = x2d.astype(jnp.bfloat16)

    kernel = functools.partial(_fused_disc_kernel, trunk_cfgs=trunk_cfgs,
                               head_cfgs=head_cfgs, neg_slope=NEG_SLOPE)
    out_shape = tuple(jax.ShapeDtypeStruct((b, c["oh"], c["ow"]), jnp.float32)
                      for c in head_cfgs)
    out_specs = [pl.BlockSpec((1, c["oh"], c["ow"]), lambda i: (i, 0, 0))
                 for c in head_cfgs]
    in_specs = [
        pl.BlockSpec((1, h, w * cin), lambda i: (i, 0, 0)),     # batch element
        pl.BlockSpec((totk, kmax, nmax), lambda i: (0, 0, 0)),  # packed weights
        pl.BlockSpec((totk, ohmax, hmax), lambda i: (0, 0, 0)), # row selectors
        pl.BlockSpec((nrows, nmax), lambda i: (0, 0)),          # packed biases
    ]
    outs = pl.pallas_call(
        kernel,
        out_shape=out_shape,
        grid_spec=pltpu.PrefetchScalarGridSpec(
            num_scalar_prefetch=0,
            grid=(b,),                            # one grid step per batch elem
            in_specs=in_specs,
            out_specs=out_specs,
        ),
        compiler_params=pltpu.CompilerParams(
            dimension_semantics=("parallel",)),   # v7x: batch elems across TCs
    )(x2d, m_all, r_all, b_all)
    return [o.reshape(b, 1, c["oh"], c["ow"]) for o, c in zip(outs, head_cfgs)]


# ------------------------- parameters / reference --------------------------- #
def _conv_params(key, cout, cin, k):
    kw_, kb_ = jax.random.split(key)
    fan_in = cin * k * k
    bound = 1.0 / math.sqrt(fan_in)
    w = jax.random.uniform(kw_, (cout, cin, k, k), jnp.float32, -bound, bound)
    b = jax.random.uniform(kb_, (cout,), jnp.float32, -bound, bound)
    return w, b


def init_params(key, opt):
    keys = jax.random.split(key, 1 + opt.dsc_layers + len(opt.dsc_scales))
    params = {"init": _conv_params(keys[0], opt.dsc_channels, 3, 7)}
    factor, prev = 1, 1
    down = []
    for i in range(opt.dsc_layers):
        factor *= 2
        down.append(_conv_params(keys[1 + i], opt.dsc_channels * factor,
                                 opt.dsc_channels * prev, 4))
        prev = factor
    params["down"] = down
    size = int(opt.load_size // factor) + 1
    heads = []
    for j, scale in enumerate(opt.dsc_scales):
        heads.append(_conv_params(keys[1 + opt.dsc_layers + j], 1,
                                  opt.dsc_channels * factor, size - scale))
    params["heads"] = heads
    return params


def _reference_forward(params, x, opt):
    """Pure-JAX f32 reference (reflect pad + lax conv) for validation."""
    def conv(x, w, bb, stride, pad, act):
        if pad:
            x = jnp.pad(x, ((0, 0), (0, 0), (pad, pad), (pad, pad)),
                        mode="reflect")
        y = jax.lax.conv_general_dilated(
            x, w, window_strides=(stride, stride), padding="VALID",
            dimension_numbers=("NCHW", "OIHW", "NCHW"),
            precision=jax.lax.Precision.HIGHEST)
        y = y + bb.reshape(1, -1, 1, 1)
        return jnp.where(y > 0, y, NEG_SLOPE * y) if act else y

    w, bb = params["init"]
    h = conv(x, w, bb, 1, 3, False)
    for (w, bb) in params["down"]:
        h = conv(h, w, bb, 2, 1, True)
    return [conv(h, w, bb, 1, 0, True) for (w, bb) in params["heads"]]


if __name__ == "__main__":
    opt = Opt()
    key = jax.random.PRNGKey(0)
    kx, kp = jax.random.split(key)
    x = jax.random.normal(kx, (2, 3, opt.load_size, opt.load_size),
                          jnp.float32)
    params = init_params(kp, opt)

    fwd = jax.jit(functools.partial(base_patch_discriminator_forward, opt=opt))
    outs = fwd(params, x)
    for o in outs:
        jax.block_until_ready(o)

    # shapes implied by the module: (N,1,1,1) and (N,1,2,2)
    assert outs[0].shape == (2, 1, 1, 1) and outs[1].shape == (2, 1, 2, 2)

    # numerical check vs pure-JAX f32 reference (kernel feeds the MXU bf16)
    refs = _reference_forward(params, x, opt)
    for o, r in zip(outs, refs):
        err = float(jnp.max(jnp.abs(o.astype(jnp.float32) - r)))
        assert err < 1e-1, f"mismatch vs reference: max abs err {err}"
    print("KERNEL_OK")
</pallas_src>

<mosaic_0001>
module attributes {stable_mosaic.version = 11 : i64} {
  func.func @_fused_disc_kernel(%arg0: i32, %arg1: memref<1x16x48xbf16, #tpu.memory_space<vmem>>, %arg2: memref<22x64x64xbf16, #tpu.memory_space<vmem>>, %arg3: memref<22x16x16xbf16, #tpu.memory_space<vmem>>, %arg4: memref<5x64xf32, #tpu.memory_space<vmem>>, %arg5: memref<1x1x1xf32, #tpu.memory_space<vmem>>, %arg6: memref<1x2x2xf32, #tpu.memory_space<vmem>>) attributes {dimension_semantics = [#tpu.dimension_semantics<parallel>], iteration_bounds = array<i64: 2>, scalar_prefetch = 0 : i64, scratch_operands = 0 : i64, tpu.core_type = #tpu.core_type<tc>, window_params = [{transform_indices = @transform_0, window_bounds = array<i64: 1, 16, 48>}, {pipeline_mode = #tpu.pipeline_mode<synchronous>, transform_indices = @transform_1, window_bounds = array<i64: 22, 64, 64>}, {pipeline_mode = #tpu.pipeline_mode<synchronous>, transform_indices = @transform_2, window_bounds = array<i64: 22, 16, 16>}, {pipeline_mode = #tpu.pipeline_mode<synchronous>, transform_indices = @transform_3, window_bounds = array<i64: 5, 64>}, {transform_indices = @transform_4, window_bounds = array<i64: 1, 1, 1>}, {transform_indices = @transform_5, window_bounds = array<i64: 1, 2, 2>}]} {
    %c0 = arith.constant 0 : index
    %c0_0 = arith.constant 0 : index
    %c0_1 = arith.constant 0 : index
    %0 = vector.load %arg1[%c0, %c0_0, %c0_1] : memref<1x16x48xbf16, #tpu.memory_space<vmem>>, vector<1x16x48xbf16>
    %1 = vector.shape_cast %0 : vector<1x16x48xbf16> to vector<16x48xbf16>
    %cst = arith.constant 0.000000e+00 : f32
    %2 = vector.broadcast %cst : f32 to vector<16x64xf32>
    %c0_2 = arith.constant 0 : index
    %c0_3 = arith.constant 0 : index
    %c0_4 = arith.constant 0 : index
    %3 = vector.load %arg3[%c0_2, %c0_3, %c0_4] : memref<22x16x16xbf16, #tpu.memory_space<vmem>>, vector<1x16x16xbf16>
    %4 = vector.shape_cast %3 : vector<1x16x16xbf16> to vector<16x16xbf16>
    %cst_5 = arith.constant dense<0.000000e+00> : vector<16x48xf32>
    %5 = tpu.matmul %4, %1, %cst_5 {dimension_numbers = #tpu.dot_dimension_numbers<[1], [0], [0], [1], [0, 0, 1, 1], [], []>} : vector<16x16xbf16>, vector<16x48xbf16>, vector<16x48xf32> -> vector<16x48xf32>
    %6 = arith.truncf %5 : vector<16x48xf32> to vector<16x48xbf16>
    %c0_6 = arith.constant 0 : index
    %c0_7 = arith.constant 0 : index
    %c0_8 = arith.constant 0 : index
    %7 = vector.load %arg2[%c0_6, %c0_7, %c0_8] : memref<22x64x64xbf16, #tpu.memory_space<vmem>>, vector<1x48x64xbf16>
    %8 = vector.shape_cast %7 : vector<1x48x64xbf16> to vector<48x64xbf16>
    %cst_9 = arith.constant dense<0.000000e+00> : vector<16x64xf32>
    %9 = tpu.matmul %6, %8, %cst_9 {dimension_numbers = #tpu.dot_dimension_numbers<[1], [0], [0], [1], [0, 0, 1, 1], [], []>} : vector<16x48xbf16>, vector<48x64xbf16>, vector<16x64xf32> -> vector<16x64xf32>
    %10 = arith.addf %2, %9 : vector<16x64xf32>
    %c1 = arith.constant 1 : index
    %c0_10 = arith.constant 0 : index
    %c0_11 = arith.constant 0 : index
    %11 = vector.load %arg3[%c1, %c0_10, %c0_11] : memref<22x16x16xbf16, #tpu.memory_space<vmem>>, vector<1x16x16xbf16>
    %12 = vector.shape_cast %11 : vector<1x16x16xbf16> to vector<16x16xbf16>
    %cst_12 = arith.constant dense<0.000000e+00> : vector<16x48xf32>
    %13 = tpu.matmul %12, %1, %cst_12 {dimension_numbers = #tpu.dot_dimension_numbers<[1], [0], [0], [1], [0, 0, 1, 1], [], []>} : vector<16x16xbf16>, vector<16x48xbf16>, vector<16x48xf32> -> vector<16x48xf32>
    %14 = arith.truncf %13 : vector<16x48xf32> to vector<16x48xbf16>
    %c1_13 = arith.constant 1 : index
    %c0_14 = arith.constant 0 : index
    %c0_15 = arith.constant 0 : index
    %15 = vector.load %arg2[%c1_13, %c0_14, %c0_15] : memref<22x64x64xbf16, #tpu.memory_space<vmem>>, vector<1x48x64xbf16>
    %16 = vector.shape_cast %15 : vector<1x48x64xbf16> to vector<48x64xbf16>
    %cst_16 = arith.constant dense<0.000000e+00> : vector<16x64xf32>
    %17 = tpu.matmul %14, %16, %cst_16 {dimension_numbers = #tpu.dot_dimension_numbers<[1], [0], [0], [1], [0, 0, 1, 1], [], []>} : vector<16x48xbf16>, vector<48x64xbf16>, vector<16x64xf32> -> vector<16x64xf32>
    %18 = arith.addf %10, %17 : vector<16x64xf32>
    %c2 = arith.constant 2 : index
    %c0_17 = arith.constant 0 : index
    %c0_18 = arith.constant 0 : index
    %19 = vector.load %arg3[%c2, %c0_17, %c0_18] : memref<22x16x16xbf16, #tpu.memory_space<vmem>>, vector<1x16x16xbf16>
    %20 = vector.shape_cast %19 : vector<1x16x16xbf16> to vector<16x16xbf16>
    %cst_19 = arith.constant dense<0.000000e+00> : vector<16x48xf32>
    %21 = tpu.matmul %20, %1, %cst_19 {dimension_numbers = #tpu.dot_dimension_numbers<[1], [0], [0], [1], [0, 0, 1, 1], [], []>} : vector<16x16xbf16>, vector<16x48xbf16>, vector<16x48xf32> -> vector<16x48xf32>
    %22 = arith.truncf %21 : vector<16x48xf32> to vector<16x48xbf16>
    %c2_20 = arith.constant 2 : index
    %c0_21 = arith.constant 0 : index
    %c0_22 = arith.constant 0 : index
    %23 = vector.load %arg2[%c2_20, %c0_21, %c0_22] : memref<22x64x64xbf16, #tpu.memory_space<vmem>>, vector<1x48x64xbf16>
    %24 = vector.shape_cast %23 : vector<1x48x64xbf16> to vector<48x64xbf16>
    %cst_23 = arith.constant dense<0.000000e+00> : vector<16x64xf32>
    %25 = tpu.matmul %22, %24, %cst_23 {dimension_numbers = #tpu.dot_dimension_numbers<[1], [0], [0], [1], [0, 0, 1, 1], [], []>} : vector<16x48xbf16>, vector<48x64xbf16>, vector<16x64xf32> -> vector<16x64xf32>
    %26 = arith.addf %18, %25 : vector<16x64xf32>
    %c3 = arith.constant 3 : index
    %c0_24 = arith.constant 0 : index
    %c0_25 = arith.constant 0 : index
    %27 = vector.load %arg3[%c3, %c0_24, %c0_25] : memref<22x16x16xbf16, #tpu.memory_space<vmem>>, vector<1x16x16xbf16>
    %28 = vector.shape_cast %27 : vector<1x16x16xbf16> to vector<16x16xbf16>
    %cst_26 = arith.constant dense<0.000000e+00> : vector<16x48xf32>
    %29 = tpu.matmul %28, %1, %cst_26 {dimension_numbers = #tpu.dot_dimension_numbers<[1], [0], [0], [1], [0, 0, 1, 1], [], []>} : vector<16x16xbf16>, vector<16x48xbf16>, vector<16x48xf32> -> vector<16x48xf32>
    %30 = arith.truncf %29 : vector<16x48xf32> to vector<16x48xbf16>
    %c3_27 = arith.constant 3 : index
    %c0_28 = arith.constant 0 : index
    %c0_29 = arith.constant 0 : index
    %31 = vector.load %arg2[%c3_27, %c0_28, %c0_29] : memref<22x64x64xbf16, #tpu.memory_space<vmem>>, vector<1x48x64xbf16>
    %32 = vector.shape_cast %31 : vector<1x48x64xbf16> to vector<48x64xbf16>
    %cst_30 = arith.constant dense<0.000000e+00> : vector<16x64xf32>
    %33 = tpu.matmul %30, %32, %cst_30 {dimension_numbers = #tpu.dot_dimension_numbers<[1], [0], [0], [1], [0, 0, 1, 1], [], []>} : vector<16x48xbf16>, vector<48x64xbf16>, vector<16x64xf32> -> vector<16x64xf32>
    %34 = arith.addf %26, %33 : vector<16x64xf32>
    %c4 = arith.constant 4 : index
    %c0_31 = arith.constant 0 : index
    %c0_32 = arith.constant 0 : index
    %35 = vector.load %arg3[%c4, %c0_31, %c0_32] : memref<22x16x16xbf16, #tpu.memory_space<vmem>>, vector<1x16x16xbf16>
    %36 = vector.shape_cast %35 : vector<1x16x16xbf16> to vector<16x16xbf16>
    %cst_33 = arith.constant dense<0.000000e+00> : vector<16x48xf32>
    %37 = tpu.matmul %36, %1, %cst_33 {dimension_numbers = #tpu.dot_dimension_numbers<[1], [0], [0], [1], [0, 0, 1, 1], [], []>} : vector<16x16xbf16>, vector<16x48xbf16>, vector<16x48xf32> -> vector<16x48xf32>
    %38 = arith.truncf %37 : vector<16x48xf32> to vector<16x48xbf16>
    %c4_34 = arith.constant 4 : index
    %c0_35 = arith.constant 0 : index
    %c0_36 = arith.constant 0 : index
    %39 = vector.load %arg2[%c4_34, %c0_35, %c0_36] : memref<22x64x64xbf16, #tpu.memory_space<vmem>>, vector<1x48x64xbf16>
    %40 = vector.shape_cast %39 : vector<1x48x64xbf16> to vector<48x64xbf16>
    %cst_37 = arith.constant dense<0.000000e+00> : vector<16x64xf32>
    %41 = tpu.matmul %38, %40, %cst_37 {dimension_numbers = #tpu.dot_dimension_numbers<[1], [0], [0], [1], [0, 0, 1, 1], [], []>} : vector<16x48xbf16>, vector<48x64xbf16>, vector<16x64xf32> -> vector<16x64xf32>
    %42 = arith.addf %34, %41 : vector<16x64xf32>
    %c5 = arith.constant 5 : index
    %c0_38 = arith.constant 0 : index
    %c0_39 = arith.constant 0 : index
    %43 = vector.load %arg3[%c5, %c0_38, %c0_39] : memref<22x16x16xbf16, #tpu.memory_space<vmem>>, vector<1x16x16xbf16>
    %44 = vector.shape_cast %43 : vector<1x16x16xbf16> to vector<16x16xbf16>
    %cst_40 = arith.constant dense<0.000000e+00> : vector<16x48xf32>
    %45 = tpu.matmul %44, %1, %cst_40 {dimension_numbers = #tpu.dot_dimension_numbers<[1], [0], [0], [1], [0, 0, 1, 1], [], []>} : vector<16x16xbf16>, vector<16x48xbf16>, vector<16x48xf32> -> vector<16x48xf32>
    %46 = arith.truncf %45 : vector<16x48xf32> to vector<16x48xbf16>
    %c5_41 = arith.constant 5 : index
    %c0_42 = arith.constant 0 : index
    %c0_43 = arith.constant 0 : index
    %47 = vector.load %arg2[%c5_41, %c0_42, %c0_43] : memref<22x64x64xbf16, #tpu.memory_space<vmem>>, vector<1x48x64xbf16>
    %48 = vector.shape_cast %47 : vector<1x48x64xbf16> to vector<48x64xbf16>
    %cst_44 = arith.constant dense<0.000000e+00> : vector<16x64xf32>
    %49 = tpu.matmul %46, %48, %cst_44 {dimension_numbers = #tpu.dot_dimension_numbers<[1], [0], [0], [1], [0, 0, 1, 1], [], []>} : vector<16x48xbf16>, vector<48x64xbf16>, vector<16x64xf32> -> vector<16x64xf32>
    %50 = arith.addf %42, %49 : vector<16x64xf32>
    %c6 = arith.constant 6 : index
    %c0_45 = arith.constant 0 : index
    %c0_46 = arith.constant 0 : index
    %51 = vector.load %arg3[%c6, %c0_45, %c0_46] : memref<22x16x16xbf16, #tpu.memory_space<vmem>>, vector<1x16x16xbf16>
    %52 = vector.shape_cast %51 : vector<1x16x16xbf16> to vector<16x16xbf16>
    %cst_47 = arith.constant dense<0.000000e+00> : vector<16x48xf32>
    %53 = tpu.matmul %52, %1, %cst_47 {dimension_numbers = #tpu.dot_dimension_numbers<[1], [0], [0], [1], [0, 0, 1, 1], [], []>} : vector<16x16xbf16>, vector<16x48xbf16>, vector<16x48xf32> -> vector<16x48xf32>
    %54 = arith.truncf %53 : vector<16x48xf32> to vector<16x48xbf16>
    %c6_48 = arith.constant 6 : index
    %c0_49 = arith.constant 0 : index
    %c0_50 = arith.constant 0 : index
    %55 = vector.load %arg2[%c6_48, %c0_49, %c0_50] : memref<22x64x64xbf16, #tpu.memory_space<vmem>>, vector<1x48x64xbf16>
    %56 = vector.shape_cast %55 : vector<1x48x64xbf16> to vector<48x64xbf16>
    %cst_51 = arith.constant dense<0.000000e+00> : vector<16x64xf32>
    %57 = tpu.matmul %54, %56, %cst_51 {dimension_numbers = #tpu.dot_dimension_numbers<[1], [0], [0], [1], [0, 0, 1, 1], [], []>} : vector<16x48xbf16>, vector<48x64xbf16>, vector<16x64xf32> -> vector<16x64xf32>
    %58 = arith.addf %50, %57 : vector<16x64xf32>
    %c0_52 = arith.constant 0 : index
    %c0_53 = arith.constant 0 : index
    %59 = vector.load %arg4[%c0_52, %c0_53] : memref<5x64xf32, #tpu.memory_space<vmem>>, vector<1x64xf32>
    %60 = vector.broadcast %59 : vector<1x64xf32> to vector<16x64xf32>
    %61 = arith.addf %58, %60 : vector<16x64xf32>
    %62 = arith.truncf %61 : vector<16x64xf32> to vector<16x64xbf16>
    %cst_54 = arith.constant 0.000000e+00 : f32
    %63 = vector.broadcast %cst_54 : f32 to vector<8x64xf32>
    %c7 = arith.constant 7 : index
    %c0_55 = arith.constant 0 : index
    %c0_56 = arith.constant 0 : index
    %64 = vector.load %arg3[%c7, %c0_55, %c0_56] : memref<22x16x16xbf16, #tpu.memory_space<vmem>>, vector<1x8x16xbf16>
    %65 = vector.shape_cast %64 : vector<1x8x16xbf16> to vector<8x16xbf16>
    %cst_57 = arith.constant dense<0.000000e+00> : vector<8x64xf32>
    %66 = tpu.matmul %65, %62, %cst_57 {dimension_numbers = #tpu.dot_dimension_numbers<[1], [0], [0], [1], [0, 0, 1, 1], [], []>} : vector<8x16xbf16>, vector<16x64xbf16>, vector<8x64xf32> -> vector<8x64xf32>
    %67 = arith.truncf %66 : vector<8x64xf32> to vector<8x64xbf16>
    %c7_58 = arith.constant 7 : index
    %c0_59 = arith.constant 0 : index
    %c0_60 = arith.constant 0 : index
    %68 = vector.load %arg2[%c7_58, %c0_59, %c0_60] : memref<22x64x64xbf16, #tpu.memory_space<vmem>>, vector<1x64x64xbf16>
    %69 = vector.shape_cast %68 : vector<1x64x64xbf16> to vector<64x64xbf16>
    %cst_61 = arith.constant dense<0.000000e+00> : vector<8x64xf32>
    %70 = tpu.matmul %67, %69, %cst_61 {dimension_numbers = #tpu.dot_dimension_numbers<[1], [0], [0], [1], [0, 0, 1, 1], [], []>} : vector<8x64xbf16>, vector<64x64xbf16>, vector<8x64xf32> -> vector<8x64xf32>
    %71 = arith.addf %63, %70 : vector<8x64xf32>
    %c8 = arith.constant 8 : index
    %c0_62 = arith.constant 0 : index
    %c0_63 = arith.constant 0 : index
    %72 = vector.load %arg3[%c8, %c0_62, %c0_63] : memref<22x16x16xbf16, #tpu.memory_space<vmem>>, vector<1x8x16xbf16>
    %73 = vector.shape_cast %72 : vector<1x8x16xbf16> to vector<8x16xbf16>
    %cst_64 = arith.constant dense<0.000000e+00> : vector<8x64xf32>
    %74 = tpu.matmul %73, %62, %cst_64 {dimension_numbers = #tpu.dot_dimension_numbers<[1], [0], [0], [1], [0, 0, 1, 1], [], []>} : vector<8x16xbf16>, vector<16x64xbf16>, vector<8x64xf32> -> vector<8x64xf32>
    %75 = arith.truncf %74 : vector<8x64xf32> to vector<8x64xbf16>
    %c8_65 = arith.constant 8 : index
    %c0_66 = arith.constant 0 : index
    %c0_67 = arith.constant 0 : index
    %76 = vector.load %arg2[%c8_65, %c0_66, %c0_67] : memref<22x64x64xbf16, #tpu.memory_space<vmem>>, vector<1x64x64xbf16>
    %77 = vector.shape_cast %76 : vector<1x64x64xbf16> to vector<64x64xbf16>
    %cst_68 = arith.constant dense<0.000000e+00> : vector<8x64xf32>
    %78 = tpu.matmul %75, %77, %cst_68 {dimension_numbers = #tpu.dot_dimension_numbers<[1], [0], [0], [1], [0, 0, 1, 1], [], []>} : vector<8x64xbf16>, vector<64x64xbf16>, vector<8x64xf32> -> vector<8x64xf32>
    %79 = arith.addf %71, %78 : vector<8x64xf32>
    %c9 = arith.constant 9 : index
    %c0_69 = arith.constant 0 : index
    %c0_70 = arith.constant 0 : index
    %80 = vector.load %arg3[%c9, %c0_69, %c0_70] : memref<22x16x16xbf16, #tpu.memory_space<vmem>>, vector<1x8x16xbf16>
    %81 = vector.shape_cast %80 : vector<1x8x16xbf16> to vector<8x16xbf16>
    %cst_71 = arith.constant dense<0.000000e+00> : vector<8x64xf32>
    %82 = tpu.matmul %81, %62, %cst_71 {dimension_numbers = #tpu.dot_dimension_numbers<[1], [0], [0], [1], [0, 0, 1, 1], [], []>} : vector<8x16xbf16>, vector<16x64xbf16>, vector<8x64xf32> -> vector<8x64xf32>
    %83 = arith.truncf %82 : vector<8x64xf32> to vector<8x64xbf16>
    %c9_72 = arith.constant 9 : index
    %c0_73 = arith.constant 0 : index
    %c0_74 = arith.constant 0 : index
    %84 = vector.load %arg2[%c9_72, %c0_73, %c0_74] : memref<22x64x64xbf16, #tpu.memory_space<vmem>>, vector<1x64x64xbf16>
    %85 = vector.shape_cast %84 : vector<1x64x64xbf16> to vector<64x64xbf16>
    %cst_75 = arith.constant dense<0.000000e+00> : vector<8x64xf32>
    %86 = tpu.matmul %83, %85, %cst_75 {dimension_numbers = #tpu.dot_dimension_numbers<[1], [0], [0], [1], [0, 0, 1, 1], [], []>} : vector<8x64xbf16>, vector<64x64xbf16>, vector<8x64xf32> -> vector<8x64xf32>
    %87 = arith.addf %79, %86 : vector<8x64xf32>
    %c10 = arith.constant 10 : index
    %c0_76 = arith.constant 0 : index
    %c0_77 = arith.constant 0 : index
    %88 = vector.load %arg3[%c10, %c0_76, %c0_77] : memref<22x16x16xbf16, #tpu.memory_space<vmem>>, vector<1x8x16xbf16>
    %89 = vector.shape_cast %88 : vector<1x8x16xbf16> to vector<8x16xbf16>
    %cst_78 = arith.constant dense<0.000000e+00> : vector<8x64xf32>
    %90 = tpu.matmul %89, %62, %cst_78 {dimension_numbers = #tpu.dot_dimension_numbers<[1], [0], [0], [1], [0, 0, 1, 1], [], []>} : vector<8x16xbf16>, vector<16x64xbf16>, vector<8x64xf32> -> vector<8x64xf32>
    %91 = arith.truncf %90 : vector<8x64xf32> to vector<8x64xbf16>
    %c10_79 = arith.constant 10 : index
    %c0_80 = arith.constant 0 : index
    %c0_81 = arith.constant 0 : index
    %92 = vector.load %arg2[%c10_79, %c0_80, %c0_81] : memref<22x64x64xbf16, #tpu.memory_space<vmem>>, vector<1x64x64xbf16>
    %93 = vector.shape_cast %92 : vector<1x64x64xbf16> to vector<64x64xbf16>
    %cst_82 = arith.constant dense<0.000000e+00> : vector<8x64xf32>
    %94 = tpu.matmul %91, %93, %cst_82 {dimension_numbers = #tpu.dot_dimension_numbers<[1], [0], [0], [1], [0, 0, 1, 1], [], []>} : vector<8x64xbf16>, vector<64x64xbf16>, vector<8x64xf32> -> vector<8x64xf32>
    %95 = arith.addf %87, %94 : vector<8x64xf32>
    %c1_83 = arith.constant 1 : index
    %c0_84 = arith.constant 0 : index
    %96 = vector.load %arg4[%c1_83, %c0_84] : memref<5x64xf32, #tpu.memory_space<vmem>>, vector<1x64xf32>
    %97 = vector.broadcast %96 : vector<1x64xf32> to vector<8x64xf32>
    %98 = arith.addf %95, %97 : vector<8x64xf32>
    %cst_85 = arith.constant 0.000000e+00 : f32
    %99 = vector.broadcast %cst_85 : f32 to vector<8x64xf32>
    %100 = arith.cmpf ogt, %98, %99 : vector<8x64xf32>
    %cst_86 = arith.constant 2.000000e-01 : f32
    %101 = vector.broadcast %cst_86 : f32 to vector<8x64xf32>
    %102 = arith.mulf %101, %98 : vector<8x64xf32>
    %103 = arith.select %100, %98, %102 : vector<8x64xi1>, vector<8x64xf32>
    %104 = arith.truncf %103 : vector<8x64xf32> to vector<8x64xbf16>
    %cst_87 = arith.constant 0.000000e+00 : f32
    %105 = vector.broadcast %cst_87 : f32 to vector<4x64xf32>
    %c11 = arith.constant 11 : index
    %c0_88 = arith.constant 0 : index
    %c0_89 = arith.constant 0 : index
    %106 = vector.load %arg3[%c11, %c0_88, %c0_89] : memref<22x16x16xbf16, #tpu.memory_space<vmem>>, vector<1x4x8xbf16>
    %107 = vector.shape_cast %106 : vector<1x4x8xbf16> to vector<4x8xbf16>
    %cst_90 = arith.constant dense<0.000000e+00> : vector<4x64xf32>
    %108 = tpu.matmul %107, %104, %cst_90 {dimension_numbers = #tpu.dot_dimension_numbers<[1], [0], [0], [1], [0, 0, 1, 1], [], []>} : vector<4x8xbf16>, vector<8x64xbf16>, vector<4x64xf32> -> vector<4x64xf32>
    %109 = arith.truncf %108 : vector<4x64xf32> to vector<4x64xbf16>
    %c11_91 = arith.constant 11 : index
    %c0_92 = arith.constant 0 : index
    %c0_93 = arith.constant 0 : index
    %110 = vector.load %arg2[%c11_91, %c0_92, %c0_93] : memref<22x64x64xbf16, #tpu.memory_space<vmem>>, vector<1x64x64xbf16>
    %111 = vector.shape_cast %110 : vector<1x64x64xbf16> to vector<64x64xbf16>
    %cst_94 = arith.constant dense<0.000000e+00> : vector<4x64xf32>
    %112 = tpu.matmul %109, %111, %cst_94 {dimension_numbers = #tpu.dot_dimension_numbers<[1], [0], [0], [1], [0, 0, 1, 1], [], []>} : vector<4x64xbf16>, vector<64x64xbf16>, vector<4x64xf32> -> vector<4x64xf32>
    %113 = arith.addf %105, %112 : vector<4x64xf32>
    %c12 = arith.constant 12 : index
    %c0_95 = arith.constant 0 : index
    %c0_96 = arith.constant 0 : index
    %114 = vector.load %arg3[%c12, %c0_95, %c0_96] : memref<22x16x16xbf16, #tpu.memory_space<vmem>>, vector<1x4x8xbf16>
    %115 = vector.shape_cast %114 : vector<1x4x8xbf16> to vector<4x8xbf16>
    %cst_97 = arith.constant dense<0.000000e+00> : vector<4x64xf32>
    %116 = tpu.matmul %115, %104, %cst_97 {dimension_numbers = #tpu.dot_dimension_numbers<[1], [0], [0], [1], [0, 0, 1, 1], [], []>} : vector<4x8xbf16>, vector<8x64xbf16>, vector<4x64xf32> -> vector<4x64xf32>
    %117 = arith.truncf %116 : vector<4x64xf32> to vector<4x64xbf16>
    %c12_98 = arith.constant 12 : index
    %c0_99 = arith.constant 0 : index
    %c0_100 = arith.constant 0 : index
    %118 = vector.load %arg2[%c12_98, %c0_99, %c0_100] : memref<22x64x64xbf16, #tpu.memory_space<vmem>>, vector<1x64x64xbf16>
    %119 = vector.shape_cast %118 : vector<1x64x64xbf16> to vector<64x64xbf16>
    %cst_101 = arith.constant dense<0.000000e+00> : vector<4x64xf32>
    %120 = tpu.matmul %117, %119, %cst_101 {dimension_numbers = #tpu.dot_dimension_numbers<[1], [0], [0], [1], [0, 0, 1, 1], [], []>} : vector<4x64xbf16>, vector<64x64xbf16>, vector<4x64xf32> -> vector<4x64xf32>
    %121 = arith.addf %113, %120 : vector<4x64xf32>
    %c13 = arith.constant 13 : index
    %c0_102 = arith.constant 0 : index
    %c0_103 = arith.constant 0 : index
    %122 = vector.load %arg3[%c13, %c0_102, %c0_103] : memref<22x16x16xbf16, #tpu.memory_space<vmem>>, vector<1x4x8xbf16>
    %123 = vector.shape_cast %122 : vector<1x4x8xbf16> to vector<4x8xbf16>
    %cst_104 = arith.constant dense<0.000000e+00> : vector<4x64xf32>
    %124 = tpu.matmul %123, %104, %cst_104 {dimension_numbers = #tpu.dot_dimension_numbers<[1], [0], [0], [1], [0, 0, 1, 1], [], []>} : vector<4x8xbf16>, vector<8x64xbf16>, vector<4x64xf32> -> vector<4x64xf32>
    %125 = arith.truncf %124 : vector<4x64xf32> to vector<4x64xbf16>
    %c13_105 = arith.constant 13 : index
    %c0_106 = arith.constant 0 : index
    %c0_107 = arith.constant 0 : index
    %126 = vector.load %arg2[%c13_105, %c0_106, %c0_107] : memref<22x64x64xbf16, #tpu.memory_space<vmem>>, vector<1x64x64xbf16>
    %127 = vector.shape_cast %126 : vector<1x64x64xbf16> to vector<64x64xbf16>
    %cst_108 = arith.constant dense<0.000000e+00> : vector<4x64xf32>
    %128 = tpu.matmul %125, %127, %cst_108 {dimension_numbers = #tpu.dot_dimension_numbers<[1], [0], [0], [1], [0, 0, 1, 1], [], []>} : vector<4x64xbf16>, vector<64x64xbf16>, vector<4x64xf32> -> vector<4x64xf32>
    %129 = arith.addf %121, %128 : vector<4x64xf32>
    %c14 = arith.constant 14 : index
    %c0_109 = arith.constant 0 : index
    %c0_110 = arith.constant 0 : index
    %130 = vector.load %arg3[%c14, %c0_109, %c0_110] : memref<22x16x16xbf16, #tpu.memory_space<vmem>>, vector<1x4x8xbf16>
    %131 = vector.shape_cast %130 : vector<1x4x8xbf16> to vector<4x8xbf16>
    %cst_111 = arith.constant dense<0.000000e+00> : vector<4x64xf32>
    %132 = tpu.matmul %131, %104, %cst_111 {dimension_numbers = #tpu.dot_dimension_numbers<[1], [0], [0], [1], [0, 0, 1, 1], [], []>} : vector<4x8xbf16>, vector<8x64xbf16>, vector<4x64xf32> -> vector<4x64xf32>
    %133 = arith.truncf %132 : vector<4x64xf32> to vector<4x64xbf16>
    %c14_112 = arith.constant 14 : index
    %c0_113 = arith.constant 0 : index
    %c0_114 = arith.constant 0 : index
    %134 = vector.load %arg2[%c14_112, %c0_113, %c0_114] : memref<22x64x64xbf16, #tpu.memory_space<vmem>>, vector<1x64x64xbf16>
    %135 = vector.shape_cast %134 : vector<1x64x64xbf16> to vector<64x64xbf16>
    %cst_115 = arith.constant dense<0.000000e+00> : vector<4x64xf32>
    %136 = tpu.matmul %133, %135, %cst_115 {dimension_numbers = #tpu.dot_dimension_numbers<[1], [0], [0], [1], [0, 0, 1, 1], [], []>} : vector<4x64xbf16>, vector<64x64xbf16>, vector<4x64xf32> -> vector<4x64xf32>
    %137 = arith.addf %129, %136 : vector<4x64xf32>
    %c2_116 = arith.constant 2 : index
    %c0_117 = arith.constant 0 : index
    %138 = vector.load %arg4[%c2_116, %c0_117] : memref<5x64xf32, #tpu.memory_space<vmem>>, vector<1x64xf32>
    %139 = vector.broadcast %138 : vector<1x64xf32> to vector<4x64xf32>
    %140 = arith.addf %137, %139 : vector<4x64xf32>
    %cst_118 = arith.constant 0.000000e+00 : f32
    %141 = vector.broadcast %cst_118 : f32 to vector<4x64xf32>
    %142 = arith.cmpf ogt, %140, %141 : vector<4x64xf32>
    %cst_119 = arith.constant 2.000000e-01 : f32
    %143 = vector.broadcast %cst_119 : f32 to vector<4x64xf32>
    %144 = arith.mulf %143, %140 : vector<4x64xf32>
    %145 = arith.select %142, %140, %144 : vector<4x64xi1>, vector<4x64xf32>
    %146 = arith.truncf %145 : vector<4x64xf32> to vector<4x64xbf16>
    %cst_120 = arith.constant 0.000000e+00 : f32
    %147 = vector.broadcast %cst_120 : f32 to vector<1x64xf32>
    %c15 = arith.constant 15 : index
    %c0_121 = arith.constant 0 : index
    %c0_122 = arith.constant 0 : index
    %148 = vector.load %arg3[%c15, %c0_121, %c0_122] : memref<22x16x16xbf16, #tpu.memory_space<vmem>>, vector<1x1x4xbf16>
    %149 = vector.shape_cast %148 : vector<1x1x4xbf16> to vector<1x4xbf16>
    %cst_123 = arith.constant dense<0.000000e+00> : vector<1x64xf32>
    %150 = tpu.matmul %149, %146, %cst_123 {dimension_numbers = #tpu.dot_dimension_numbers<[1], [0], [0], [1], [0, 0, 1, 1], [], []>} : vector<1x4xbf16>, vector<4x64xbf16>, vector<1x64xf32> -> vector<1x64xf32>
    %151 = arith.truncf %150 : vector<1x64xf32> to vector<1x64xbf16>
    %c15_124 = arith.constant 15 : index
    %c0_125 = arith.constant 0 : index
    %c0_126 = arith.constant 0 : index
    %152 = vector.load %arg2[%c15_124, %c0_125, %c0_126] : memref<22x64x64xbf16, #tpu.memory_space<vmem>>, vector<1x64x64xbf16>
    %153 = vector.shape_cast %152 : vector<1x64x64xbf16> to vector<64x64xbf16>
    %cst_127 = arith.constant dense<0.000000e+00> : vector<1x64xf32>
    %154 = tpu.matmul %151, %153, %cst_127 {dimension_numbers = #tpu.dot_dimension_numbers<[1], [0], [0], [1], [0, 0, 1, 1], [], []>} : vector<1x64xbf16>, vector<64x64xbf16>, vector<1x64xf32> -> vector<1x64xf32>
    %155 = arith.addf %147, %154 : vector<1x64xf32>
    %c16 = arith.constant 16 : index
    %c0_128 = arith.constant 0 : index
    %c0_129 = arith.constant 0 : index
    %156 = vector.load %arg3[%c16, %c0_128, %c0_129] : memref<22x16x16xbf16, #tpu.memory_space<vmem>>, vector<1x1x4xbf16>
    %157 = vector.shape_cast %156 : vector<1x1x4xbf16> to vector<1x4xbf16>
    %cst_130 = arith.constant dense<0.000000e+00> : vector<1x64xf32>
    %158 = tpu.matmul %157, %146, %cst_130 {dimension_numbers = #tpu.dot_dimension_numbers<[1], [0], [0], [1], [0, 0, 1, 1], [], []>} : vector<1x4xbf16>, vector<4x64xbf16>, vector<1x64xf32> -> vector<1x64xf32>
    %159 = arith.truncf %158 : vector<1x64xf32> to vector<1x64xbf16>
    %c16_131 = arith.constant 16 : index
    %c0_132 = arith.constant 0 : index
    %c0_133 = arith.constant 0 : index
    %160 = vector.load %arg2[%c16_131, %c0_132, %c0_133] : memref<22x64x64xbf16, #tpu.memory_space<vmem>>, vector<1x64x64xbf16>
    %161 = vector.shape_cast %160 : vector<1x64x64xbf16> to vector<64x64xbf16>
    %cst_134 = arith.constant dense<0.000000e+00> : vector<1x64xf32>
    %162 = tpu.matmul %159, %161, %cst_134 {dimension_numbers = #tpu.dot_dimension_numbers<[1], [0], [0], [1], [0, 0, 1, 1], [], []>} : vector<1x64xbf16>, vector<64x64xbf16>, vector<1x64xf32> -> vector<1x64xf32>
    %163 = arith.addf %155, %162 : vector<1x64xf32>
    %c17 = arith.constant 17 : index
    %c0_135 = arith.constant 0 : index
    %c0_136 = arith.constant 0 : index
    %164 = vector.load %arg3[%c17, %c0_135, %c0_136] : memref<22x16x16xbf16, #tpu.memory_space<vmem>>, vector<1x1x4xbf16>
    %165 = vector.shape_cast %164 : vector<1x1x4xbf16> to vector<1x4xbf16>
    %cst_137 = arith.constant dense<0.000000e+00> : vector<1x64xf32>
    %166 = tpu.matmul %165, %146, %cst_137 {dimension_numbers = #tpu.dot_dimension_numbers<[1], [0], [0], [1], [0, 0, 1, 1], [], []>} : vector<1x4xbf16>, vector<4x64xbf16>, vector<1x64xf32> -> vector<1x64xf32>
    %167 = arith.truncf %166 : vector<1x64xf32> to vector<1x64xbf16>
    %c17_138 = arith.constant 17 : index
    %c0_139 = arith.constant 0 : index
    %c0_140 = arith.constant 0 : index
    %168 = vector.load %arg2[%c17_138, %c0_139, %c0_140] : memref<22x64x64xbf16, #tpu.memory_space<vmem>>, vector<1x64x64xbf16>
    %169 = vector.shape_cast %168 : vector<1x64x64xbf16> to vector<64x64xbf16>
    %cst_141 = arith.constant dense<0.000000e+00> : vector<1x64xf32>
    %170 = tpu.matmul %167, %169, %cst_141 {dimension_numbers = #tpu.dot_dimension_numbers<[1], [0], [0], [1], [0, 0, 1, 1], [], []>} : vector<1x64xbf16>, vector<64x64xbf16>, vector<1x64xf32> -> vector<1x64xf32>
    %171 = arith.addf %163, %170 : vector<1x64xf32>
    %c18 = arith.constant 18 : index
    %c0_142 = arith.constant 0 : index
    %c0_143 = arith.constant 0 : index
    %172 = vector.load %arg3[%c18, %c0_142, %c0_143] : memref<22x16x16xbf16, #tpu.memory_space<vmem>>, vector<1x1x4xbf16>
    %173 = vector.shape_cast %172 : vector<1x1x4xbf16> to vector<1x4xbf16>
    %cst_144 = arith.constant dense<0.000000e+00> : vector<1x64xf32>
    %174 = tpu.matmul %173, %146, %cst_144 {dimension_numbers = #tpu.dot_dimension_numbers<[1], [0], [0], [1], [0, 0, 1, 1], [], []>} : vector<1x4xbf16>, vector<4x64xbf16>, vector<1x64xf32> -> vector<1x64xf32>
    %175 = arith.truncf %174 : vector<1x64xf32> to vector<1x64xbf16>
    %c18_145 = arith.constant 18 : index
    %c0_146 = arith.constant 0 : index
    %c0_147 = arith.constant 0 : index
    %176 = vector.load %arg2[%c18_145, %c0_146, %c0_147] : memref<22x64x64xbf16, #tpu.memory_space<vmem>>, vector<1x64x64xbf16>
    %177 = vector.shape_cast %176 : vector<1x64x64xbf16> to vector<64x64xbf16>
    %cst_148 = arith.constant dense<0.000000e+00> : vector<1x64xf32>
    %178 = tpu.matmul %175, %177, %cst_148 {dimension_numbers = #tpu.dot_dimension_numbers<[1], [0], [0], [1], [0, 0, 1, 1], [], []>} : vector<1x64xbf16>, vector<64x64xbf16>, vector<1x64xf32> -> vector<1x64xf32>
    %179 = arith.addf %171, %178 : vector<1x64xf32>
    %c3_149 = arith.constant 3 : index
    %c0_150 = arith.constant 0 : index
    %180 = vector.load %arg4[%c3_149, %c0_150] : memref<5x64xf32, #tpu.memory_space<vmem>>, vector<1x64xf32>
    %181 = arith.addf %179, %180 : vector<1x64xf32>
    %cst_151 = arith.constant 0.000000e+00 : f32
    %182 = vector.broadcast %cst_151 : f32 to vector<1x64xf32>
    %183 = arith.cmpf ogt, %181, %182 : vector<1x64xf32>
    %cst_152 = arith.constant 2.000000e-01 : f32
    %184 = vector.broadcast %cst_152 : f32 to vector<1x64xf32>
    %185 = arith.mulf %184, %181 : vector<1x64xf32>
    %186 = arith.select %183, %181, %185 : vector<1x64xi1>, vector<1x64xf32>
    %187 = vector.extract_strided_slice %186 {offsets = [0, 0], sizes = [1, 1], strides = [1, 1]} : vector<1x64xf32> to vector<1x1xf32>
    %188 = vector.shape_cast %187 : vector<1x1xf32> to vector<1x1x1xf32>
    %c0_153 = arith.constant 0 : index
    %c0_154 = arith.constant 0 : index
    %c0_155 = arith.constant 0 : index
    %189 = vector.load %arg5[%c0_153, %c0_154, %c0_155] : memref<1x1x1xf32, #tpu.memory_space<vmem>>, vector<1x1x1xf32>
    tpu.vector_store %arg5[%c0_153, %c0_154, %c0_155], %188 {strides = array<i32>} : memref<1x1x1xf32, #tpu.memory_space<vmem>>, vector<1x1x1xf32>,
    %cst_156 = arith.constant 0.000000e+00 : f32
    %190 = vector.broadcast %cst_156 : f32 to vector<2x64xf32>
    %c19 = arith.constant 19 : index
    %c0_157 = arith.constant 0 : index
    %c0_158 = arith.constant 0 : index
    %191 = vector.load %arg3[%c19, %c0_157, %c0_158] : memref<22x16x16xbf16, #tpu.memory_space<vmem>>, vector<1x2x4xbf16>
    %192 = vector.shape_cast %191 : vector<1x2x4xbf16> to vector<2x4xbf16>
    %cst_159 = arith.constant dense<0.000000e+00> : vector<2x64xf32>
    %193 = tpu.matmul %192, %146, %cst_159 {dimension_numbers = #tpu.dot_dimension_numbers<[1], [0], [0], [1], [0, 0, 1, 1], [], []>} : vector<2x4xbf16>, vector<4x64xbf16>, vector<2x64xf32> -> vector<2x64xf32>
    %194 = arith.truncf %193 : vector<2x64xf32> to vector<2x64xbf16>
    %c19_160 = arith.constant 19 : index
    %c0_161 = arith.constant 0 : index
    %c0_162 = arith.constant 0 : index
    %195 = vector.load %arg2[%c19_160, %c0_161, %c0_162] : memref<22x64x64xbf16, #tpu.memory_space<vmem>>, vector<1x64x64xbf16>
    %196 = vector.shape_cast %195 : vector<1x64x64xbf16> to vector<64x64xbf16>
    %cst_163 = arith.constant dense<0.000000e+00> : vector<2x64xf32>
    %197 = tpu.matmul %194, %196, %cst_163 {dimension_numbers = #tpu.dot_dimension_numbers<[1], [0], [0], [1], [0, 0, 1, 1], [], []>} : vector<2x64xbf16>, vector<64x64xbf16>, vector<2x64xf32> -> vector<2x64xf32>
    %198 = arith.addf %190, %197 : vector<2x64xf32>
    %c20 = arith.constant 20 : index
    %c0_164 = arith.constant 0 : index
    %c0_165 = arith.constant 0 : index
    %199 = vector.load %arg3[%c20, %c0_164, %c0_165] : memref<22x16x16xbf16, #tpu.memory_space<vmem>>, vector<1x2x4xbf16>
    %200 = vector.shape_cast %199 : vector<1x2x4xbf16> to vector<2x4xbf16>
    %cst_166 = arith.constant dense<0.000000e+00> : vector<2x64xf32>
    %201 = tpu.matmul %200, %146, %cst_166 {dimension_numbers = #tpu.dot_dimension_numbers<[1], [0], [0], [1], [0, 0, 1, 1], [], []>} : vector<2x4xbf16>, vector<4x64xbf16>, vector<2x64xf32> -> vector<2x64xf32>
    %202 = arith.truncf %201 : vector<2x64xf32> to vector<2x64xbf16>
    %c20_167 = arith.constant 20 : index
    %c0_168 = arith.constant 0 : index
    %c0_169 = arith.constant 0 : index
    %203 = vector.load %arg2[%c20_167, %c0_168, %c0_169] : memref<22x64x64xbf16, #tpu.memory_space<vmem>>, vector<1x64x64xbf16>
    %204 = vector.shape_cast %203 : vector<1x64x64xbf16> to vector<64x64xbf16>
    %cst_170 = arith.constant dense<0.000000e+00> : vector<2x64xf32>
    %205 = tpu.matmul %202, %204, %cst_170 {dimension_numbers = #tpu.dot_dimension_numbers<[1], [0], [0], [1], [0, 0, 1, 1], [], []>} : vector<2x64xbf16>, vector<64x64xbf16>, vector<2x64xf32> -> vector<2x64xf32>
    %206 = arith.addf %198, %205 : vector<2x64xf32>
    %c21 = arith.constant 21 : index
    %c0_171 = arith.constant 0 : index
    %c0_172 = arith.constant 0 : index
    %207 = vector.load %arg3[%c21, %c0_171, %c0_172] : memref<22x16x16xbf16, #tpu.memory_space<vmem>>, vector<1x2x4xbf16>
    %208 = vector.shape_cast %207 : vector<1x2x4xbf16> to vector<2x4xbf16>
    %cst_173 = arith.constant dense<0.000000e+00> : vector<2x64xf32>
    %209 = tpu.matmul %208, %146, %cst_173 {dimension_numbers = #tpu.dot_dimension_numbers<[1], [0], [0], [1], [0, 0, 1, 1], [], []>} : vector<2x4xbf16>, vector<4x64xbf16>, vector<2x64xf32> -> vector<2x64xf32>
    %210 = arith.truncf %209 : vector<2x64xf32> to vector<2x64xbf16>
    %c21_174 = arith.constant 21 : index
    %c0_175 = arith.constant 0 : index
    %c0_176 = arith.constant 0 : index
    %211 = vector.load %arg2[%c21_174, %c0_175, %c0_176] : memref<22x64x64xbf16, #tpu.memory_space<vmem>>, vector<1x64x64xbf16>
    %212 = vector.shape_cast %211 : vector<1x64x64xbf16> to vector<64x64xbf16>
    %cst_177 = arith.constant dense<0.000000e+00> : vector<2x64xf32>
    %213 = tpu.matmul %210, %212, %cst_177 {dimension_numbers = #tpu.dot_dimension_numbers<[1], [0], [0], [1], [0, 0, 1, 1], [], []>} : vector<2x64xbf16>, vector<64x64xbf16>, vector<2x64xf32> -> vector<2x64xf32>
    %214 = arith.addf %206, %213 : vector<2x64xf32>
    %c4_178 = arith.constant 4 : index
    %c0_179 = arith.constant 0 : index
    %215 = vector.load %arg4[%c4_178, %c0_179] : memref<5x64xf32, #tpu.memory_space<vmem>>, vector<1x64xf32>
    %216 = vector.broadcast %215 : vector<1x64xf32> to vector<2x64xf32>
    %217 = arith.addf %214, %216 : vector<2x64xf32>
    %cst_180 = arith.constant 0.000000e+00 : f32
    %218 = vector.broadcast %cst_180 : f32 to vector<2x64xf32>
    %219 = arith.cmpf ogt, %217, %218 : vector<2x64xf32>
    %cst_181 = arith.constant 2.000000e-01 : f32
    %220 = vector.broadcast %cst_181 : f32 to vector<2x64xf32>
    %221 = arith.mulf %220, %217 : vector<2x64xf32>
    %222 = arith.select %219, %217, %221 : vector<2x64xi1>, vector<2x64xf32>
    %223 = vector.extract_strided_slice %222 {offsets = [0, 0], sizes = [2, 2], strides = [1, 1]} : vector<2x64xf32> to vector<2x2xf32>
    %224 = vector.shape_cast %223 : vector<2x2xf32> to vector<1x2x2xf32>
    %c0_182 = arith.constant 0 : index
    %c0_183 = arith.constant 0 : index
    %c0_184 = arith.constant 0 : index
    %225 = vector.load %arg6[%c0_182, %c0_183, %c0_184] : memref<1x2x2xf32, #tpu.memory_space<vmem>>, vector<1x2x2xf32>
    tpu.vector_store %arg6[%c0_182, %c0_183, %c0_184], %224 {strides = array<i32>} : memref<1x2x2xf32, #tpu.memory_space<vmem>>, vector<1x2x2xf32>,
    return
  }
  func.func @transform_0(%arg0: i32) -> (i32, i32, i32) {
    %c0_i32 = arith.constant 0 : i32
    %c0_i32_0 = arith.constant 0 : i32
    %c0_i32_1 = arith.constant 0 : i32
    return %arg0, %c0_i32, %c0_i32_0 : i32, i32, i32
  }
  func.func @transform_1(%arg0: i32) -> (i32, i32, i32) {
    %c0_i32 = arith.constant 0 : i32
    %c0_i32_0 = arith.constant 0 : i32
    %c0_i32_1 = arith.constant 0 : i32
    %c0_i32_2 = arith.constant 0 : i32
    return %c0_i32, %c0_i32_0, %c0_i32_1 : i32, i32, i32
  }
  func.func @transform_2(%arg0: i32) -> (i32, i32, i32) {
    %c0_i32 = arith.constant 0 : i32
    %c0_i32_0 = arith.constant 0 : i32
    %c0_i32_1 = arith.constant 0 : i32
    %c0_i32_2 = arith.constant 0 : i32
    return %c0_i32, %c0_i32_0, %c0_i32_1 : i32, i32, i32
  }
  func.func @transform_3(%arg0: i32) -> (i32, i32) {
    %c0_i32 = arith.constant 0 : i32
    %c0_i32_0 = arith.constant 0 : i32
    %c0_i32_1 = arith.constant 0 : i32
    return %c0_i32, %c0_i32_0 : i32, i32
  }
  func.func @transform_4(%arg0: i32) -> (i32, i32, i32) {
    %c0_i32 = arith.constant 0 : i32
    %c0_i32_0 = arith.constant 0 : i32
    %c0_i32_1 = arith.constant 0 : i32
    return %arg0, %c0_i32, %c0_i32_0 : i32, i32, i32
  }
  func.func @transform_5(%arg0: i32) -> (i32, i32, i32) {
    %c0_i32 = arith.constant 0 : i32
    %c0_i32_0 = arith.constant 0 : i32
    %c0_i32_1 = arith.constant 0 : i32
    return %arg0, %c0_i32, %c0_i32_0 : i32, i32, i32
  }
}

</mosaic_0001>

<bundles_post_ra>
// kernel: tile.23
= control target key start
LH: loop header
LB: loop body
LE: loop exit
PB: predicated region body
PF: predicated region fallthrough
CT: control target
= control target key end

     0   :  { %2 = vsyncpa [#allocation1], 0  ;;  %s47_s6 = smov [#allocation0]   ;;  %s76_s0 = inlined_call_operand.hbm [shape: f32[4], index: 0, kind: input, shape index: {}]   ;;  %s77_s1 = inlined_call_operand.vmem [shape: f32[16,4], index: 1, kind: output, shape index: {}]  }
   0x1   :  { %s9_s7 = sshll.u32 %s47_s6, 4  ;;  %s23_s10 = scalar_lea.hbm %s76_s0, 16  ;;  %s10_s7 = int_to_ptr.vmem [resolvable:$true] %s9_s7 }
   0x2   :  { %p24_p0 = scmp.ne.s32.totalorder %s76_s0, %s23_s10  ;;  %p27_p1 = scmp.lt.u32.totalorder %s23_s10, %s76_s0 }
   0x4   :  { %p29_p2 = pnand %p27_p1, %p24_p0 }
   0x6   :  { %32 = shalt.err (!%p29_p2)
}
   0x7   :  { %s33_s15 = scalar_lea.vmem %s10_s7, 16  ;;  %s37_s16 = scalar_lea.vmem %s10_s7, 32 }
   0x8   :  { %p34_p3 = scmp.ne.s32.totalorder %s10_s7, %s33_s15  ;;  %p38_p4 = scmp.lt.s32.totalorder %s10_s7, %s10_s7 }
   0x9   :  { %p39_p5 = scmp.lt.s32.totalorder %s37_s16, %s33_s15 }
   0xb   :  { %p40_p6 = por %p39_p5, %p38_p4 }
   0xd   :  { %p41_p7 = pnand %p40_p6, %p34_p3 }
   0xf   :  { %44 = shalt.err (!%p41_p7)
}
  0x10   :  { %12 = dma.hbm_to_vmem [thread:$0]  %s76_s0, 16, %s10_s7, [#allocation1]  }
  0x11   :  { %45 = dma.done.wait [#allocation1], 16  }
  0x12   :  { %46 = vsyncadd [#allocation1], 4294967280  ;;  %v16_v0 = vld [vmem:[#allocation0] ss:$0 sm:$0xff] }
  0x13   :  { %17 = vst [vmem:[%s77_s1] sm:$0xff] %v16_v0  ;;  %21 = vst [vmem:[%s77_s1 + $0x8] sm:$0xff] %v16_v0 }
  0x14   :  { %20 = vsyncpa [#allocation1], 1 }

// kernel: tile.28
= control target key start
LH: loop header
LB: loop body
LE: loop exit
PB: predicated region body
PF: predicated region fallthrough
CT: control target
= control target key end

     0   :  { %2 = vsyncpa [#allocation1], 0  ;;  %s44_s6 = smov [#allocation0]   ;;  %s70_s0 = inlined_call_operand.hbm [shape: f32[8], index: 0, kind: input, shape index: {}]   ;;  %s71_s1 = inlined_call_operand.vmem [shape: f32[8,8], index: 1, kind: output, shape index: {}]  }
   0x1   :  { %s9_s7 = sshll.u32 %s44_s6, 4  ;;  %s20_s10 = scalar_lea.hbm %s70_s0, 16  ;;  %s10_s7 = int_to_ptr.vmem [resolvable:$true] %s9_s7 }
   0x2   :  { %p21_p0 = scmp.ne.s32.totalorder %s70_s0, %s20_s10  ;;  %p24_p1 = scmp.lt.u32.totalorder %s20_s10, %s70_s0 }
   0x4   :  { %p26_p2 = pnand %p24_p1, %p21_p0 }
   0x6   :  { %29 = shalt.err (!%p26_p2)
}
   0x7   :  { %s30_s15 = scalar_lea.vmem %s10_s7, 16  ;;  %s34_s16 = scalar_lea.vmem %s10_s7, 32 }
   0x8   :  { %p31_p3 = scmp.ne.s32.totalorder %s10_s7, %s30_s15  ;;  %p35_p4 = scmp.lt.s32.totalorder %s10_s7, %s10_s7 }
   0x9   :  { %p36_p5 = scmp.lt.s32.totalorder %s34_s16, %s30_s15 }
   0xb   :  { %p37_p6 = por %p36_p5, %p35_p4 }
   0xd   :  { %p38_p7 = pnand %p37_p6, %p31_p3 }
   0xf   :  { %41 = shalt.err (!%p38_p7)
}
  0x10   :  { %12 = dma.hbm_to_vmem [thread:$0]  %s70_s0, 16, %s10_s7, [#allocation1]  }
  0x11   :  { %42 = dma.done.wait [#allocation1], 16  }
  0x12   :  { %43 = vsyncadd [#allocation1], 4294967280  ;;  %v16_v0 = vld [vmem:[#allocation0] ss:$0 sm:$0xff] }
  0x13   :  { %17 = vst [vmem:[%s71_s1] sm:$0xff] %v16_v0 }
  0x14   :  { %18 = vsyncpa [#allocation1], 1 }

// kernel: tile.33
= control target key start
LH: loop header
LB: loop body
LE: loop exit
PB: predicated region body
PF: predicated region fallthrough
CT: control target
= control target key end

     0   :  { %2 = vsyncpa [#allocation1], 0  ;;  %s44_s6 = smov [#allocation0]   ;;  %s70_s0 = inlined_call_operand.hbm [shape: f32[16], index: 0, kind: input, shape index: {}]   ;;  %s71_s1 = inlined_call_operand.vmem [shape: f32[4,16], index: 1, kind: output, shape index: {}]  }
   0x1   :  { %s9_s7 = sshll.u32 %s44_s6, 4  ;;  %s20_s10 = scalar_lea.hbm %s70_s0, 16  ;;  %s10_s7 = int_to_ptr.vmem [resolvable:$true] %s9_s7 }
   0x2   :  { %p21_p0 = scmp.ne.s32.totalorder %s70_s0, %s20_s10  ;;  %p24_p1 = scmp.lt.u32.totalorder %s20_s10, %s70_s0 }
   0x4   :  { %p26_p2 = pnand %p24_p1, %p21_p0 }
   0x6   :  { %29 = shalt.err (!%p26_p2)
}
   0x7   :  { %s30_s15 = scalar_lea.vmem %s10_s7, 16  ;;  %s34_s16 = scalar_lea.vmem %s10_s7, 32 }
   0x8   :  { %p31_p3 = scmp.ne.s32.totalorder %s10_s7, %s30_s15  ;;  %p35_p4 = scmp.lt.s32.totalorder %s10_s7, %s10_s7 }
   0x9   :  { %p36_p5 = scmp.lt.s32.totalorder %s34_s16, %s30_s15 }
   0xb   :  { %p37_p6 = por %p36_p5, %p35_p4 }
   0xd   :  { %p38_p7 = pnand %p37_p6, %p31_p3 }
   0xf   :  { %41 = shalt.err (!%p38_p7)
}
  0x10   :  { %12 = dma.hbm_to_vmem [thread:$0]  %s70_s0, 16, %s10_s7, [#allocation1]  }
  0x11   :  { %42 = dma.done.wait [#allocation1], 16  }
  0x12   :  { %43 = vsyncadd [#allocation1], 4294967280  ;;  %v16_v0 = vld [vmem:[#allocation0] ss:$0 sm:$0xff] }
  0x13   :  { %17 = vst [vmem:[%s71_s1] sm:$0xf] %v16_v0 }
  0x14   :  { %18 = vsyncpa [#allocation1], 1 }

// kernel: base_patch_discriminator_forward.1
= control target key start
LH: loop header
LB: loop body
LE: loop exit
PB: predicated region body
PF: predicated region fallthrough
CT: control target
= control target key end

     0   :  { %11 = vsyncpa [#allocation3], 0  ;;  %s4875_s0 = inlined_call_operand.vmem [shape: bf16[2,16,48], index: 0, kind: input, shape index: {}]   ;;  %s4876_s1 = inlined_call_operand.vmem [shape: bf16[22,64,64], index: 1, kind: input, shape index: {}]   ;;  %s4877_s2 = inlined_call_operand.vmem [shape: bf16[22,16,16], index: 2, kind: input, shape index: {}]   ;;  %s4878_s3 = inlined_call_operand.vmem [shape: f32[5,64], index: 3, kind: input, shape index: {}]   ;;  %s4879_s4 = inlined_call_operand.vmem [shape: f32[2,1,1], index: 4, kind: output, shape index: {0}]   ;;  %s4880_s5 = inlined_call_operand.hbm [shape: f32[2,2,2], index: 5, kind: output, shape index: {1}]  }
   0x1   :  { %13 = vsyncpa [#allocation3 + $0x1], 0  ;;  %s4185_s18 = smov 0   ;;  %s4187_s19 = smov 0  }
   0x2   :  { %s4189_s20 = smov 0   ;;  %s4191_s21 = smov 0  }
   0x3 LB: > { %s4206_s22 = sadd.s32 4294967295, %s4150_s21   ;;  %s3097_s23 = sadd.s32 4294967294, %s4150_s21   ;;  %s4150_s21 = sphi %s4191_s21, %s4886_s21   ;;  %s4146_s20 = sphi %s4189_s20, %s4885_s20   ;;  %s4142_s19 = sphi %s4187_s19, %s4884_s19   ;;  %s4138_s18 = sphi %s4185_s18, %s4883_s18  }
   0x4   : > { %s4210_s24 = sadd.s32 1, %s4150_s21   ;;  %s141_s25 = sadd.s32 1, %s4146_s20 }
   0x5   : > { %s138_s26 = ssub.s32 %s4150_s21, %s4210_s24  ;;  %p151_p0 = scmp.ne.s32.totalorder %s4146_s20, %s4142_s19 }
   0x6   : > { %p139_p1 = scmp.eq.s32.totalorder %s138_s26, 0  ;;  %p152_p2 = scmp.eq.s32.totalorder %s4206_s22, 1 }
   0x7   : > { %p157_p3 = scmp.ne.s32.totalorder %s4142_s19, %s4138_s18  ;;  %p158_p4 = scmp.eq.s32.totalorder %s3097_s23, 1 }
   0x8   : > { %s4221_s27 = scalar_select %p139_p1, %s4146_s20, %s141_s25  }
   0x9   : > { %p4223_p5 = por %p152_p2, %p151_p0  ;;  %p4227_p6 = por %p158_p4, %p157_p3 }
   0xa   : > { %p3100_p7 = scmp.ge.s32.totalorder %s4150_s21, 1  ;;  %p193_p8 = scmp.lt.s32.totalorder %s4150_s21, 3 }
   0xc   : > { %p194_p9 = pnand %p3100_p7, %p193_p8 }
   0xd   : > { %p224_p10 = scmp.lt.s32.totalorder (!%p194_p9), %s4206_s22, 1  ;;  %v4152_v0 = vmov (!%p194_p9), 0.0   ;;  %vm4153_vm0 = vmmov (!%p194_p9), 0   ;;  %v4002_v1 = vld [vmem:[%s4876_s1] sm:$0xff] (!%p194_p9)   ;;  %v4003_v2 = vld [vmem:[%s4876_s1 + $0x8] sm:$0xff] (!%p194_p9)   ;;  %vm248_vm1 = vcmask (!%p194_p9), 130048  }
   0xe   : > { %197 = sbr.rel (%p194_p9) target bundleno = 3423 (0xd5f), region = 36  ;;  %3576 = vmatprep.subr.bf16.mxu0 (!%p194_p9), %v4152_v0  ;;  %3578 = vmatprep.mubr.msk.bf16.mxu0 (!%p194_p9), %vm4153_vm0, %v4152_v0  ;;  %v4000_v3 = vld [vmem:[%s4877_s2] sm:$0xff] (!%p194_p9)   ;;  %v4001_v5 = vld [vmem:[%s4877_s2 + $0x8] sm:$0xff] (!%p194_p9)   ;;  %v4005_v7 = vld [vmem:[%s4876_s1 + $0x10] sm:$0xff] (!%p194_p9)   ;;  %vm378_vm2 = vcmask (!%p194_p9), 392192   ;;  %vm1247_vm3 = vcmask (!%p194_p9), 523264  }
   0xf   : > { %3598 = vmatprep.subr.bf16.mxu1 (!%p194_p9), %v4152_v0  ;;  %3604 = vmatprep.mubr.msk.bf16.mxu1 (!%p194_p9), %vm4153_vm0, %v4152_v0  ;;  %v4004_v6 = vld [vmem:[%s4876_s1 + $0x20] sm:$0xff] (!%p194_p9)   ;;  %v4006_v8 = vld [vmem:[%s4876_s1 + $0x28] sm:$0xff] (!%p194_p9)   ;;  %v4007_v9 = vld [vmem:[%s4876_s1 + $0x30] sm:$0xff] (!%p194_p9)   ;;  %vm1620_vm5 = vcmask (!%p194_p9), 1043456   ;;  %vm1616_vm6 = vcmask (!%p194_p9), 64512   ;;  %vm2125_vm8 = vcmask (!%p194_p9), 1041408  }
  0x10   : > { %3599 = vmatpush3.bf16.msra.mxu1 (!%p194_p9), %v4002_v1  ;;  %v4008_v20 = vld [vmem:[%s4877_s2 + $0x10] sm:$0xff] (!%p194_p9)   ;;  %v4009_v21 = vld [vmem:[%s4877_s2 + $0x18] sm:$0xff] (!%p194_p9)   ;;  %v4010_v22 = vld [vmem:[%s4877_s2 + $0x20] sm:$0xff] (!%p194_p9)   ;;  %vm2121_vm9 = vcmask (!%p194_p9), 31744   ;;  %vm2619_vm11 = vcmask (!%p194_p9), 0   ;;  %s221_s16 = sand.u32 (!%p194_p9), 1, %s4142_s19  }
  0x11   : > { %3600 = vmatprep.subr.bf16.mxu1 (!%p194_p9), %v4152_v0  ;;  %v4011_v23 = vld [vmem:[%s4876_s1 + $0x40] sm:$0xff] (!%p194_p9)   ;;  %v4012_v24 = vld [vmem:[%s4876_s1 + $0x48] sm:$0xff] (!%p194_p9)   ;;  %v4013_v25 = vld [vmem:[%s4876_s1 + $0x50] sm:$0xff] (!%p194_p9)   ;;  %s3101_s17 = sshll.u32 (!%p194_p9), %s221_s16, 1  ;;  %s3425_s26 = sshll.u32 (!%p194_p9), %s4206_s22, 5  ;;  %vm2997_vm13 = vcmask (!%p194_p9), 9216  }
  0x12   : > { %v4016_v26 = vld [vmem:[%s4876_s1 + $0x80] sm:$0xff] (!%p194_p9)   ;;  %v4018_v27 = vld [vmem:[%s4876_s1 + $0x88] sm:$0xff] (!%p194_p9)   ;;  %v4019_v28 = vld [vmem:[%s4876_s1 + $0x90] sm:$0xff] (!%p194_p9)   ;;  %s4833_s9 = scalar_lea.hbm (!%p194_p9), %s4880_s5, %s3425_s26  ;;  %s3003_s10 = scalar_lea.sflag (!%p194_p9), [#allocation3], %s221_s16 }
  0x13   : > { %v4014_v42 = vld [vmem:[%s4876_s1 + $0x60] sm:$0xff] (!%p194_p9)   ;;  %v4015_v45 = vld [vmem:[%s4876_s1 + $0x68] sm:$0xff] (!%p194_p9)   ;;  %v4017_v49 = vld [vmem:[%s4876_s1 + $0x70] sm:$0xff] (!%p194_p9)  }
  0x14   : > { %3601 = vmatpush3.bf16.msra.mxu1 (!%p194_p9), %v4003_v2  ;;  %v4020_v57 = vld [vmem:[%s4877_s2 + $0x28] sm:$0xff] (!%p194_p9)   ;;  %v4021_v58 = vld [vmem:[%s4877_s2 + $0x30] sm:$0xff] (!%p194_p9)   ;;  %v4022_v59 = vld [vmem:[%s4876_s1 + $0xa0] sm:$0xff] (!%p194_p9)  }
  0x15   : > { %s4238_s30 = scalar_select %p224_p10, %s4206_s22, 1  ;;  %3602 = vmatprep.subr.bf16.mxu1 %v4152_v0  ;;  %v4023_v60 = vld [vmem:[%s4876_s1 + $0xa8] sm:$0xff]   ;;  %v4024_v61 = vld [vmem:[%s4876_s1 + $0xc0] sm:$0xff]   ;;  %v4025_v62 = vld [vmem:[%s4876_s1 + $0xb0] sm:$0xff]  }
  0x16   : > { %v4026_v63 = vld [vmem:[%s4876_s1 + $0xc8] sm:$0xff]   ;;  %v4027_v1 = vld [vmem:[%s4876_s1 + $0xd0] sm:$0xff]   ;;  %s4154_s22 = smov [#allocation2]  }
  0x17   : > { %s3428_s8 = sshll.u32 %s4238_s30, 3  ;;  %s231_s6 = scalar_lea.vmem %s4879_s4, %s4238_s30 }
  0x18   : > { %s228_s13 = scalar_lea.vmem %s4875_s0, %s3428_s8  ;;  %3603 = vmatpush3.bf16.msra.mxu1 %v4005_v7  ;;  %s4092_s12 = sshll.u32 %s4154_s22, 4  ;;  %s4093_s12 = int_to_ptr.vmem [resolvable:$false] %s4092_s12 }
  0x19   : > { %v4257_v4 = vld [vmem:[%s228_s13] sm:$0xff]   ;;  %3614 = vmatprep.subr.bf16.mxu1 %v4152_v0  ;;  %s4094_s13 = scalar_lea.vmem %s4093_s12, 64 }
  0x1a   : > { %3577 = vmatpush3.bf16.msra.mxu0 %v4257_v4 }
  0x1b   : > { %3582 = vmatprep.subr.bf16.mxu0 %v4152_v0 }
  0x1d   : > { %3579 = vmatmul.mubr.msk.bf16.vlgmr.msra.gmra.mrb[0].mxu0 %vm248_vm1, %v4000_v3 }
  0x1e   : > { %3583 = vmatpush3.bf16.msra.mxu0 %v4257_v4  ;;  %3584 = vmatprep.mubr.msk.bf16.mxu0 %vm4153_vm0, %v4152_v0 }
  0x1f   : > { %3588 = vmatprep.subr.bf16.mxu0 %v4152_v0 }
  0x25   : > { %3585 = vmatmul.mubr.msk.bf16.vlgmr.msra.gmra.mrb[4].mxu0 %vm248_vm1, %v4001_v5 }
  0x26   : > { %3594 = vmatprep.mubr.msk.bf16.mxu0 %vm4153_vm0, %v4152_v0  ;;  %3589 = vmatpush3.bf16.msra.mxu0 %v4004_v6 }
  0x27   : > { %3590 = vmatprep.subr.bf16.mxu0 %v4152_v0 }
  0x2a   : > { %3591 = vmatpush3.bf16.msra.mxu0 %v4006_v8 }
  0x2b   : > { %3592 = vmatprep.subr.bf16.mxu0 %v4152_v0 }
  0x2e   : > { %3593 = vmatpush3.bf16.msra.mxu0 %v4007_v9 }
  0x2f   : > { %3608 = vmatprep.subr.bf16.mxu0 %v4152_v0 }
  0xf0   : > { %v286_v10 = vpop.f32.mrb[0].mxu0 }
  0xf1   : > { %v3580_v11 = vpop.f32.mrb[1].mxu0 }
  0xf2   : > { %v289_v12 = vpop.f32.mrb[2].mxu0 }
  0xf3   : > { %v293_v13 = vpack.c.bf16 %v289_v12, %v286_v10  ;;  %v3581_v14 = vpop.f32.mrb[3].mxu0 }
  0xf5   : > { %3605 = vmatmul.mubr.msk.bf16.vlgmr.msra.gmra.mrb[0].mxu1 %vm378_vm2, %v293_v13 }
  0xf6   : > { %3620 = vmatprep.mubr.msk.bf16.mxu1 %vm4153_vm0, %v4152_v0  ;;  %3615 = vmatpush3.bf16.msra.mxu1 %v4011_v23 }
  0xf7   : > { %3616 = vmatprep.subr.bf16.mxu1 %v4152_v0 }
  0xf8   : > { %v345_v15 = vpop.f32.mrb[4].mxu0 }
  0xf9   : > { %v3586_v16 = vpop.f32.mrb[5].mxu0 }
  0xfa   : > { %v348_v17 = vpop.f32.mrb[6].mxu0  ;;  %3617 = vmatpush3.bf16.msra.mxu1 %v4012_v24 }
  0xfb   : > { %v352_v18 = vpack.c.bf16 %v348_v17, %v345_v15  ;;  %v3587_v19 = vpop.f32.mrb[7].mxu0  ;;  %3618 = vmatprep.subr.bf16.mxu1 %v4152_v0 }
  0xfd   : > { %3595 = vmatmul.mubr.msk.bf16.vlgmr.msra.gmra.mrb[8].mxu0 %vm378_vm2, %v352_v18 }
  0xfe   : > { %3609 = vmatpush3.bf16.msra.mxu0 %v4257_v4  ;;  %3610 = vmatprep.mubr.msk.bf16.mxu0 %vm4153_vm0, %v4152_v0 }
  0xff   : > { %3624 = vmatprep.subr.bf16.mxu0 %v4152_v0  ;;  %3619 = vmatpush3.bf16.msra.mxu1 %v4013_v25 }
 0x100   : > { %3630 = vmatprep.subr.bf16.mxu1 %v4152_v0 }
 0x105   : > { %3611 = vmatmul.mubr.msk.bf16.vlgmr.msra.gmra.mrb[12].mxu0 %vm248_vm1, %v4008_v20 }
 0x106   : > { %3625 = vmatpush3.bf16.msra.mxu0 %v4257_v4  ;;  %3626 = vmatprep.mubr.msk.bf16.mxu0 %vm4153_vm0, %v4152_v0 }
 0x107   : > { %3640 = vmatprep.subr.bf16.mxu0 %v4152_v0 }
 0x10d   : > { %3627 = vmatmul.mubr.msk.bf16.vlgmr.msra.gmra.mrb[16].mxu0 %vm248_vm1, %v4009_v21 }
 0x10e   : > { %3641 = vmatpush3.bf16.msra.mxu0 %v4257_v4  ;;  %3642 = vmatprep.mubr.msk.bf16.mxu0 %vm4153_vm0, %v4152_v0 }
 0x10f   : > { %3646 = vmatprep.subr.bf16.mxu0 %v4152_v0 }
 0x115   : > { %3643 = vmatmul.mubr.msk.bf16.vlgmr.msra.gmra.mrb[20].mxu0 %vm248_vm1, %v4010_v22 }
 0x116   : > { %3652 = vmatprep.mubr.msk.bf16.mxu0 %vm4153_vm0, %v4152_v0  ;;  %3647 = vmatpush3.bf16.msra.mxu0 %v4016_v26 }
 0x117   : > { %3648 = vmatprep.subr.bf16.mxu0 %v4152_v0 }
 0x11a   : > { %3649 = vmatpush3.bf16.msra.mxu0 %v4018_v27 }
 0x11b   : > { %3650 = vmatprep.subr.bf16.mxu0 %v4152_v0 }
 0x11e   : > { %3651 = vmatpush3.bf16.msra.mxu0 %v4019_v28 }
 0x11f   : > { %3672 = vmatprep.subr.bf16.mxu0 %v4152_v0 }
 0x1c8   : > { %v478_v29 = vpop.f32.mrb[0].mxu1 }
 0x1c9   : > { %v3606_v30 = vpop.f32.mrb[1].mxu1 }
 0x1ca   : > { %v481_v31 = vpop.f32.mrb[2].mxu1  ;;  %v4030_v30 = vld [vmem:[%s4876_s1 + $0x100] sm:$0xff]  }
 0x1cb   : > { %v3607_v32 = vpop.f32.mrb[3].mxu1 }
 0x1d0   : > { %v416_v33 = vpop.f32.mrb[8].mxu0 }
 0x1d1   : > { %v4343_v34 = vadd.f32 %v478_v29, %v416_v33  ;;  %v3596_v35 = vpop.f32.mrb[9].mxu0 }
 0x1d2   : > { %v419_v36 = vpop.f32.mrb[10].mxu0 }
 0x1d3   : > { %v4345_v37 = vadd.f32 %v481_v31, %v419_v36  ;;  %v3597_v38 = vpop.f32.mrb[11].mxu0  ;;  %v4032_v31 = vld [vmem:[%s4876_s1 + $0x108] sm:$0xff]  }
 0x1d8   : > { %v530_v39 = vpop.f32.mrb[12].mxu0 }
 0x1d9   : > { %v3612_v40 = vpop.f32.mrb[13].mxu0 }
 0x1da   : > { %v533_v41 = vpop.f32.mrb[14].mxu0 }
 0x1db   : > { %v537_v43 = vpack.c.bf16 %v533_v41, %v530_v39  ;;  %v3613_v44 = vpop.f32.mrb[15].mxu0  ;;  %v3195_v41 = vld [vmem:[%s4878_s3] ss:$0 sm:$0xff] }
 0x1dd   : > { %3621 = vmatmul.mubr.msk.bf16.vlgmr.msra.gmra.mrb[4].mxu1 %vm378_vm2, %v537_v43 }
 0x1de   : > { %3631 = vmatpush3.bf16.msra.mxu1 %v4014_v42  ;;  %3636 = vmatprep.mubr.msk.bf16.mxu1 %vm4153_vm0, %v4152_v0 }
 0x1df   : > { %3632 = vmatprep.subr.bf16.mxu1 %v4152_v0 }
 0x1e0   : > { %v654_v46 = vpop.f32.mrb[16].mxu0 }
 0x1e1   : > { %v3628_v47 = vpop.f32.mrb[17].mxu0 }
 0x1e2   : > { %3633 = vmatpush3.bf16.msra.mxu1 %v4015_v45  ;;  %v657_v48 = vpop.f32.mrb[18].mxu0 }
 0x1e3   : > { %v661_v50 = vpack.c.bf16 %v657_v48, %v654_v46  ;;  %v3629_v51 = vpop.f32.mrb[19].mxu0  ;;  %3634 = vmatprep.subr.bf16.mxu1 %v4152_v0  ;;  %v3196_v48 = vld [vmem:[%s4877_s2 + $0x38] sm:$0xf] }
 0x1e4   : > { %v4029_v51 = vld [vmem:[%s4876_s1 + $0xe8] sm:$0xff]  }
 0x1e6   : > { %3635 = vmatpush3.bf16.msra.mxu1 %v4017_v49  ;;  %v3206_v49 = vld [vmem:[%s4877_s2 + $0x40] sm:$0xf] }
 0x1e7   : > { %3656 = vmatprep.subr.bf16.mxu1 %v4152_v0 }
 0x1e8   : > { %v778_v52 = vpop.f32.mrb[20].mxu0 }
 0x1e9   : > { %3637 = vmatmul.mubr.msk.bf16.vlgmr.msra.gmra.mrb[8].mxu1 %vm378_vm2, %v661_v50  ;;  %v3644_v53 = vpop.f32.mrb[21].mxu0  ;;  %v4028_v50 = vld [vmem:[%s4876_s1 + $0xe0] sm:$0xff]  }
 0x1ea   : > { %v781_v54 = vpop.f32.mrb[22].mxu0  ;;  %3657 = vmatpush3.bf16.msra.mxu1 %v4257_v4  ;;  %3658 = vmatprep.mubr.msk.bf16.mxu1 %vm4153_vm0, %v4152_v0  ;;  %v4033_v53 = vld [vmem:[%s4876_s1 + $0xf8] sm:$0xff]  }
 0x1eb   : > { %v785_v55 = vpack.c.bf16 %v781_v54, %v778_v52  ;;  %v3645_v56 = vpop.f32.mrb[23].mxu0  ;;  %3662 = vmatprep.subr.bf16.mxu1 %v4152_v0  ;;  %v4031_v52 = vld [vmem:[%s4876_s1 + $0xf0] sm:$0xff]  }
 0x1ec   : > { %v4034_v54 = vld [vmem:[%s4876_s1 + $0x110] sm:$0xff]  }
 0x1ed   : > { %3653 = vmatmul.mubr.msk.bf16.vlgmr.msra.gmra.mrb[24].mxu0 %vm378_vm2, %v785_v55  ;;  %v4035_v55 = vld [vmem:[%s4876_s1 + $0x118] sm:$0xff]  }
 0x1ee   : > { %3673 = vmatpush3.bf16.msra.mxu0 %v4257_v4  ;;  %3674 = vmatprep.mubr.msk.bf16.mxu0 %vm4153_vm0, %v4152_v0 }
 0x1ef   : > { %3678 = vmatprep.subr.bf16.mxu0 %v4152_v0 }
 0x1f1   : > { %3659 = vmatmul.mubr.msk.bf16.vlgmr.msra.gmra.mrb[12].mxu1 %vm248_vm1, %v4020_v57 }
 0x1f2   : > { %3668 = vmatprep.mubr.msk.bf16.mxu1 %vm4153_vm0, %v4152_v0  ;;  %3663 = vmatpush3.bf16.msra.mxu1 %v4022_v59 }
 0x1f3   : > { %3664 = vmatprep.subr.bf16.mxu1 %v4152_v0 }
 0x1f5   : > { %3675 = vmatmul.mubr.msk.bf16.vlgmr.msra.gmra.mrb[28].mxu0 %vm248_vm1, %v4021_v58 }
 0x1f6   : > { %3684 = vmatprep.mubr.msk.bf16.mxu0 %vm4153_vm0, %v4152_v0  ;;  %3665 = vmatpush3.bf16.msra.mxu1 %v4023_v60 }
 0x1f7   : > { %3679 = vmatpush3.bf16.msra.mxu0 %v4024_v61  ;;  %3666 = vmatprep.subr.bf16.mxu1 %v4152_v0 }
 0x1f8   : > { %3680 = vmatprep.subr.bf16.mxu0 %v4152_v0 }
 0x1fa   : > { %3667 = vmatpush3.bf16.msra.mxu1 %v4025_v62 }
 0x1fb   : > { %3681 = vmatpush3.bf16.msra.mxu0 %v4026_v63  ;;  %3688 = vmatprep.subr.bf16.mxu1 %v4152_v0 }
 0x1fc   : > { %3682 = vmatprep.subr.bf16.mxu0 %v4152_v0 }
 0x1ff   : > { %3683 = vmatpush3.bf16.msra.mxu0 %v4027_v1 }
 0x200   : > { %3700 = vmatprep.subr.bf16.mxu0 %v4152_v0 }
 0x2b0   : > { %v600_v2 = vpop.f32.mrb[4].mxu1 }
 0x2b1   : > { %v607_v3 = vadd.f32 %v600_v2, %v4343_v34  ;;  %v3622_v4 = vpop.f32.mrb[5].mxu1 }
 0x2b2   : > { %v603_v5 = vpop.f32.mrb[6].mxu1  ;;  %v3241_v4 = vld [vmem:[%s4877_s2 + $0x50] sm:$0xf] }
 0x2b3   : > { %v608_v6 = vadd.f32 %v603_v5, %v4345_v37  ;;  %v3623_v7 = vpop.f32.mrb[7].mxu1  ;;  %v4036_v5 = vld [vmem:[%s4876_s1 + $0x120] sm:$0xff]  }
 0x2b4   : > { %v4038_v7 = vld [vmem:[%s4876_s1 + $0x130] sm:$0xff]  }
 0x2bc   : > { %v724_v8 = vpop.f32.mrb[8].mxu1 }
 0x2bd   : > { %v731_v9 = vadd.f32 %v724_v8, %v607_v3  ;;  %v3638_v10 = vpop.f32.mrb[9].mxu1  ;;  %v3226_v3 = vld [vmem:[%s4877_s2 + $0x48] sm:$0xf]  ;;  %v4039_v8 = vld [vmem:[%s4876_s1 + $0x140] sm:$0xff]  }
 0x2be   : > { %v727_v11 = vpop.f32.mrb[10].mxu1  ;;  %v4041_v10 = vld [vmem:[%s4876_s1 + $0x148] sm:$0xff]  }
 0x2bf   : > { %v732_v12 = vadd.f32 %v727_v11, %v608_v6  ;;  %v3639_v13 = vpop.f32.mrb[11].mxu1  ;;  %v4037_v6 = vld [vmem:[%s4876_s1 + $0x128] sm:$0xff]   ;;  %v4042_v11 = vld [vmem:[%s4876_s1 + $0x150] sm:$0xff]  }
 0x2c0   : > { %v848_v14 = vpop.f32.mrb[24].mxu0 }
 0x2c1   : > { %v855_v15 = vadd.f32 %v848_v14, %v731_v9  ;;  %v3654_v16 = vpop.f32.mrb[25].mxu0  ;;  %v4040_v9 = vld [vmem:[%s4876_s1 + $0x138] sm:$0xff]  }
 0x2c2   : > { %v851_v17 = vpop.f32.mrb[26].mxu0 }
 0x2c3   : > { %v856_v18 = vadd.f32 %v851_v17, %v732_v12  ;;  %v3655_v19 = vpop.f32.mrb[27].mxu0  ;;  %v4043_v12 = vld [vmem:[%s4876_s1 + $0x158] sm:$0xff]  }
 0x2c4   : > { %v902_v20 = vpop.f32.mrb[12].mxu1 }
 0x2c5   : > { %v3660_v21 = vpop.f32.mrb[13].mxu1 }
 0x2c6   : > { %v905_v22 = vpop.f32.mrb[14].mxu1 }
 0x2c7   : > { %v909_v23 = vpack.c.bf16 %v905_v22, %v902_v20  ;;  %v3661_v24 = vpop.f32.mrb[15].mxu1 }
 0x2c8   : > { %v1026_v25 = vpop.f32.mrb[28].mxu0 }
 0x2c9   : > { %3669 = vmatmul.mubr.msk.bf16.vlgmr.msra.gmra.mrb[16].mxu1 %vm378_vm2, %v909_v23  ;;  %v3676_v26 = vpop.f32.mrb[29].mxu0 }
 0x2ca   : > { %v1029_v27 = vpop.f32.mrb[30].mxu0  ;;  %3690 = vmatprep.mubr.msk.bf16.mxu1 %vm4153_vm0, %v4152_v0 }
 0x2cb   : > { %v1033_v28 = vpack.c.bf16 %v1029_v27, %v1026_v25  ;;  %v3677_v29 = vpop.f32.mrb[31].mxu0 }
 0x2cd   : > { %3685 = vmatmul.mubr.msk.bf16.vlgmr.msra.gmra.mrb[32].mxu0 %vm378_vm2, %v1033_v28 }
 0x2ce   : > { %3708 = vmatprep.mubr.msk.bf16.mxu0 %vm4153_vm0, %v4152_v0  ;;  %3701 = vmatpush3.bf16.msra.mxu0 %v4030_v30 }
 0x2cf   : > { %3702 = vmatprep.subr.bf16.mxu0 %v4152_v0 }
 0x2d2   : > { %3703 = vmatpush3.bf16.msra.mxu0 %v4032_v31 }
 0x2d3   : > { %3704 = vmatprep.subr.bf16.mxu0 %v4152_v0 }
 0x2d6   : > { %3705 = vmatpush3.bf16.msra.mxu0 %v4034_v54  ;;  %v4047_v54 = vld [vmem:[%s4876_s1 + $0x170] sm:$0xff]  }
 0x2d7   : > { %3706 = vmatprep.subr.bf16.mxu0 %v4152_v0 }
 0x2da   : > { %3707 = vmatpush3.bf16.msra.mxu0 %v4035_v55  ;;  %v4049_v55 = vld [vmem:[%s4876_s1 + $0x178] sm:$0xff]  }
 0x2db   : > { %3724 = vmatprep.subr.bf16.mxu0 %v4152_v0 }
 0x39c   : > { %v972_v32 = vpop.f32.mrb[16].mxu1 }
 0x39d   : > { %v979_v33 = vadd.f32 %v972_v32, %v855_v15  ;;  %v3670_v34 = vpop.f32.mrb[17].mxu1  ;;  %v4046_v32 = vld [vmem:[%s4876_s1 + $0x180] sm:$0xff]  }
 0x39e   : > { %v975_v35 = vpop.f32.mrb[18].mxu1 }
 0x39f   : > { %v980_v36 = vadd.f32 %v975_v35, %v856_v18  ;;  %v3671_v37 = vpop.f32.mrb[19].mxu1 }
 0x3a0   : > { %v1096_v38 = vpop.f32.mrb[32].mxu0 }
 0x3a1   : > { %v1103_v39 = vadd.f32 %v1096_v38, %v979_v33  ;;  %v3686_v40 = vpop.f32.mrb[33].mxu0  ;;  %v4048_v33 = vld [vmem:[%s4876_s1 + $0x188] sm:$0xff]  }
 0x3a2   : > { %v1099_v42 = vpop.f32.mrb[34].mxu0  ;;  %v3256_v40 = vld [vmem:[%s4878_s3 + $0x1] ss:$0 sm:$0xff] }
 0x3a3   : > { %v1104_v43 = vadd.f32 %v1099_v42, %v980_v36  ;;  %v3687_v44 = vpop.f32.mrb[35].mxu0  ;;  %v1110_v45 = vadd.f32 %v3195_v41, %v1103_v39 }
 0x3a5   : > { %v1111_v46 = vadd.f32 %v3195_v41, %v1104_v43 }
 0x3a7   : > { %v1112_v47 = vpack.c.bf16 %v1111_v46, %v1110_v45 }
 0x3a9   : > { %3689 = vmatpush3.bf16.msra.mxu1 %v1112_v47 }
 0x3aa   : > { %3694 = vmatprep.subr.bf16.mxu1 %v4152_v0 }
 0x3ac   : > { %3691 = vmatmul.mubr.msk.bf16.vlgmr.msra.gmra.mrb[20].mxu1 %vm248_vm1, %v3196_v48 }
 0x3ad   : > { %3695 = vmatpush3.bf16.msra.mxu1 %v1112_v47  ;;  %3696 = vmatprep.mubr.msk.bf16.mxu1 %vm4153_vm0, %v4152_v0 }
 0x3ae   : > { %3712 = vmatprep.subr.bf16.mxu1 %v4152_v0 }
 0x3b4   : > { %3697 = vmatmul.mubr.msk.bf16.vlgmr.msra.gmra.mrb[24].mxu1 %vm248_vm1, %v3206_v49 }
 0x3b5   : > { %3713 = vmatpush3.bf16.msra.mxu1 %v4028_v50  ;;  %3720 = vmatprep.mubr.msk.bf16.mxu1 %vm4153_vm0, %v4152_v0  ;;  %v3257_v50 = vld [vmem:[%s4877_s2 + $0x58] sm:$0x3] }
 0x3b6   : > { %3714 = vmatprep.subr.bf16.mxu1 %v4152_v0 }
 0x3b9   : > { %3715 = vmatpush3.bf16.msra.mxu1 %v4029_v51  ;;  %v3267_v51 = vld [vmem:[%s4877_s2 + $0x60] sm:$0x3] }
 0x3ba   : > { %3716 = vmatprep.subr.bf16.mxu1 %v4152_v0 }
 0x3bd   : > { %3717 = vmatpush3.bf16.msra.mxu1 %v4031_v52  ;;  %v4044_v52 = vld [vmem:[%s4876_s1 + $0x160] sm:$0xff]  }
 0x3be   : > { %3718 = vmatprep.subr.bf16.mxu1 %v4152_v0 }
 0x3c1   : > { %3719 = vmatpush3.bf16.msra.mxu1 %v4033_v53  ;;  %v4045_v53 = vld [vmem:[%s4876_s1 + $0x168] sm:$0xff]  }
 0x3c2   : > { %3730 = vmatprep.subr.bf16.mxu1 %v4152_v0 }
 0x47f   : > { %v1152_v56 = vpop.f32.mrb[20].mxu1 }
 0x480   : > { %v1158_v57 = vpack.c.bf16 %v1152_v56, %v1152_v56  ;;  %v3692_v58 = vpop.f32.mrb[21].mxu1  ;;  %v4050_v56 = vld [vmem:[%s4876_s1 + $0x190] sm:$0xff]  }
 0x481   : > { %v1155_v59 = vpop.f32.mrb[22].mxu1 }
 0x482   : > { %v3693_v60 = vpop.f32.mrb[23].mxu1  ;;  %3721 = vmatmul.mubr.msk.bf16.vlgmr.msra.gmra.mrb[28].mxu1 %vm1247_vm3, %v1158_v57  ;;  %v4051_v57 = vld [vmem:[%s4876_s1 + $0x198] sm:$0xff]  }
 0x483   : > { %3738 = vmatprep.mubr.msk.bf16.mxu1 %vm4153_vm0, %v4152_v0  ;;  %3731 = vmatpush3.bf16.msra.mxu1 %v4036_v5  ;;  %v3287_v5 = vld [vmem:[%s4877_s2 + $0x68] sm:$0x3] }
 0x484   : > { %3732 = vmatprep.subr.bf16.mxu1 %v4152_v0 }
 0x487   : > { %v1207_v61 = vpop.f32.mrb[24].mxu1  ;;  %3733 = vmatpush3.bf16.msra.mxu1 %v4037_v6  ;;  %v3302_v6 = vld [vmem:[%s4877_s2 + $0x70] sm:$0x3] }
 0x488   : > { %v1213_v62 = vpack.c.bf16 %v1207_v61, %v1207_v61  ;;  %v3698_v63 = vpop.f32.mrb[25].mxu1  ;;  %3734 = vmatprep.subr.bf16.mxu1 %v4152_v0 }
 0x489   : > { %v1210_v1 = vpop.f32.mrb[26].mxu1 }
 0x48a   : > { %v3699_v2 = vpop.f32.mrb[27].mxu1  ;;  %3709 = vmatmul.mubr.msk.bf16.vlgmr.msra.gmra.mrb[36].mxu0 %vm1247_vm3, %v1213_v62 }
 0x48b   : > { %3725 = vmatpush3.bf16.msra.mxu0 %v1112_v47  ;;  %3726 = vmatprep.mubr.msk.bf16.mxu0 %vm4153_vm0, %v4152_v0 }
 0x48c   : > { %3742 = vmatprep.subr.bf16.mxu0 %v4152_v0  ;;  %3735 = vmatpush3.bf16.msra.mxu1 %v4038_v7  ;;  %v4052_v7 = vld [vmem:[%s4876_s1 + $0x1a0] sm:$0xff]  }
 0x48d   : > { %3736 = vmatprep.subr.bf16.mxu1 %v4152_v0 }
 0x490   : > { %3737 = vmatpush3.bf16.msra.mxu1 %v4040_v9  ;;  %v4054_v9 = vld [vmem:[%s4876_s1 + $0x1b0] sm:$0xff]  }
 0x491   : > { %3760 = vmatprep.subr.bf16.mxu1 %v4152_v0 }
 0x492   : > { %3727 = vmatmul.mubr.msk.bf16.vlgmr.msra.gmra.mrb[40].mxu0 %vm248_vm1, %v3226_v3 }
 0x493   : > { %3743 = vmatpush3.bf16.msra.mxu0 %v1112_v47  ;;  %3744 = vmatprep.mubr.msk.bf16.mxu0 %vm4153_vm0, %v4152_v0 }
 0x494   : > { %3748 = vmatprep.subr.bf16.mxu0 %v4152_v0 }
 0x49a   : > { %3745 = vmatmul.mubr.msk.bf16.vlgmr.msra.gmra.mrb[44].mxu0 %vm248_vm1, %v3241_v4 }
 0x49b   : > { %3756 = vmatprep.mubr.msk.bf16.mxu0 %vm4153_vm0, %v4152_v0  ;;  %3749 = vmatpush3.bf16.msra.mxu0 %v4039_v8  ;;  %v4053_v8 = vld [vmem:[%s4876_s1 + $0x1a8] sm:$0xff]  }
 0x49c   : > { %3750 = vmatprep.subr.bf16.mxu0 %v4152_v0 }
 0x49f   : > { %3751 = vmatpush3.bf16.msra.mxu0 %v4041_v10  ;;  %v4055_v10 = vld [vmem:[%s4876_s1 + $0x1c0] sm:$0xff]  }
 0x4a0   : > { %3752 = vmatprep.subr.bf16.mxu0 %v4152_v0 }
 0x4a3   : > { %3753 = vmatpush3.bf16.msra.mxu0 %v4042_v11  ;;  %v4056_v11 = vld [vmem:[%s4876_s1 + $0x1b8] sm:$0xff]  }
 0x4a4   : > { %3754 = vmatprep.subr.bf16.mxu0 %v4152_v0 }
 0x4a7   : > { %3755 = vmatpush3.bf16.msra.mxu0 %v4043_v12  ;;  %v4057_v12 = vld [vmem:[%s4876_s1 + $0x1c8] sm:$0xff]  }
 0x4a8   : > { %3772 = vmatprep.subr.bf16.mxu0 %v4152_v0 }
 0x555   : > { %v1352_v13 = vpop.f32.mrb[28].mxu1 }
 0x556   : > { %v3722_v14 = vpop.f32.mrb[29].mxu1 }
 0x557   : > { %v1355_v15 = vpop.f32.mrb[30].mxu1  ;;  %v4059_v14 = vld [vmem:[%s4876_s1 + $0x1d8] sm:$0xff]  }
 0x558   : > { %v3723_v16 = vpop.f32.mrb[31].mxu1 }
 0x55d   : > { %v1285_v17 = vpop.f32.mrb[36].mxu0 }
 0x55e   : > { %v1353_v18 = vadd.f32 %v1352_v13, %v1285_v17  ;;  %v3710_v19 = vpop.f32.mrb[37].mxu0  ;;  %v4058_v13 = vld [vmem:[%s4876_s1 + $0x1d0] sm:$0xff]  }
 0x55f   : > { %v1288_v20 = vpop.f32.mrb[38].mxu0 }
 0x560   : > { %v3711_v21 = vpop.f32.mrb[39].mxu0 }
 0x565   : > { %v1397_v22 = vpop.f32.mrb[40].mxu0 }
 0x566   : > { %v1403_v23 = vpack.c.bf16 %v1397_v22, %v1397_v22  ;;  %v3728_v24 = vpop.f32.mrb[41].mxu0 }
 0x567   : > { %v1400_v25 = vpop.f32.mrb[42].mxu0 }
 0x568   : > { %v3729_v26 = vpop.f32.mrb[43].mxu0  ;;  %3739 = vmatmul.mubr.msk.bf16.vlgmr.msra.gmra.mrb[32].mxu1 %vm1247_vm3, %v1403_v23 }
 0x569   : > { %3762 = vmatprep.mubr.msk.bf16.mxu1 %vm4153_vm0, %v4152_v0 }
 0x56d   : > { %v1520_v27 = vpop.f32.mrb[44].mxu0 }
 0x56e   : > { %v1526_v28 = vpack.c.bf16 %v1520_v27, %v1520_v27  ;;  %v3746_v29 = vpop.f32.mrb[45].mxu0 }
 0x56f   : > { %v1523_v30 = vpop.f32.mrb[46].mxu0 }
 0x570   : > { %v3747_v31 = vpop.f32.mrb[47].mxu0  ;;  %3757 = vmatmul.mubr.msk.bf16.vlgmr.msra.gmra.mrb[48].mxu0 %vm1247_vm3, %v1526_v28 }
 0x571   : > { %3780 = vmatprep.mubr.msk.bf16.mxu0 %vm4153_vm0, %v4152_v0  ;;  %3773 = vmatpush3.bf16.msra.mxu0 %v4046_v32 }
 0x572   : > { %3774 = vmatprep.subr.bf16.mxu0 %v4152_v0 }
 0x575   : > { %3775 = vmatpush3.bf16.msra.mxu0 %v4048_v33 }
 0x576   : > { %3776 = vmatprep.subr.bf16.mxu0 %v4152_v0 }
 0x579   : > { %3777 = vmatpush3.bf16.msra.mxu0 %v4050_v56  ;;  %v4063_v56 = vld [vmem:[%s4876_s1 + $0x1f0] sm:$0xff]  }
 0x57a   : > { %3778 = vmatprep.subr.bf16.mxu0 %v4152_v0 }
 0x57d   : > { %3779 = vmatpush3.bf16.msra.mxu0 %v4051_v57  ;;  %v4065_v57 = vld [vmem:[%s4876_s1 + $0x1f8] sm:$0xff]  }
 0x57e   : > { %3796 = vmatprep.subr.bf16.mxu0 %v4152_v0 }
 0x63b   : > { %v1474_v34 = vpop.f32.mrb[32].mxu1 }
 0x63c   : > { %v1480_v35 = vadd.f32 %v1474_v34, %v1353_v18  ;;  %v3740_v36 = vpop.f32.mrb[33].mxu1  ;;  %v4062_v34 = vld [vmem:[%s4876_s1 + $0x200] sm:$0xff]  }
 0x63d   : > { %v1477_v37 = vpop.f32.mrb[34].mxu1 }
 0x63e   : > { %v3741_v38 = vpop.f32.mrb[35].mxu1 }
 0x643   : > { %v1597_v39 = vpop.f32.mrb[48].mxu0 }
 0x644   : > { %v1603_v41 = vadd.f32 %v1597_v39, %v1480_v35  ;;  %v3758_v42 = vpop.f32.mrb[49].mxu0  ;;  %v4064_v35 = vld [vmem:[%s4876_s1 + $0x208] sm:$0xff]  }
 0x645   : > { %v1600_v43 = vpop.f32.mrb[50].mxu0  ;;  %v3317_v42 = vld [vmem:[%s4878_s3 + $0x2] ss:$0 sm:$0xff] }
 0x646   : > { %v1609_v44 = vadd.f32 %v3256_v40, %v1603_v41  ;;  %v3759_v45 = vpop.f32.mrb[51].mxu0 }
 0x648   : > { %vm1610_vm4 = vcmp.gt.f32.partialorder %v1609_v44, 0.0  ;;  %v1611_v46 = vmul.f32 0.2, %v1609_v44 }
 0x64a   : > { %v1612_v47 = vsel %vm1610_vm4, %v1609_v44, %v1611_v46 }
 0x64b   : > { %v1613_v48 = vpack.c.bf16 %v1612_v47, %v1612_v47 }
 0x64d   : > { %v1622_v49 = vsel %vm1620_vm5, %v1613_v48, 0 }
 0x64e   : > { %3761 = vmatpush3.bf16.msra.mxu1 %v1622_v49 }
 0x64f   : > { %3766 = vmatprep.subr.bf16.mxu1 %v4152_v0 }
 0x651   : > { %3763 = vmatmul.mubr.msk.bf16.vlgmr.msra.gmra.mrb[36].mxu1 %vm1616_vm6, %v3257_v50 }
 0x652   : > { %3767 = vmatpush3.bf16.msra.mxu1 %v1622_v49  ;;  %3768 = vmatprep.mubr.msk.bf16.mxu1 %vm4153_vm0, %v4152_v0 }
 0x653   : > { %3784 = vmatprep.subr.bf16.mxu1 %v4152_v0 }
 0x659   : > { %3769 = vmatmul.mubr.msk.bf16.vlgmr.msra.gmra.mrb[40].mxu1 %vm1616_vm6, %v3267_v51 }
 0x65a   : > { %3785 = vmatpush3.bf16.msra.mxu1 %v4044_v52  ;;  %3792 = vmatprep.mubr.msk.bf16.mxu1 %vm4153_vm0, %v4152_v0  ;;  %v3318_v52 = vld [vmem:[%s4877_s2 + $0x78] sm:$0x1] }
 0x65b   : > { %3786 = vmatprep.subr.bf16.mxu1 %v4152_v0 }
 0x65e   : > { %3787 = vmatpush3.bf16.msra.mxu1 %v4045_v53  ;;  %v3328_v53 = vld [vmem:[%s4877_s2 + $0x80] sm:$0x1] }
 0x65f   : > { %3788 = vmatprep.subr.bf16.mxu1 %v4152_v0 }
 0x662   : > { %3789 = vmatpush3.bf16.msra.mxu1 %v4047_v54  ;;  %v4060_v54 = vld [vmem:[%s4876_s1 + $0x1e0] sm:$0xff]  }
 0x663   : > { %3790 = vmatprep.subr.bf16.mxu1 %v4152_v0 }
 0x666   : > { %3791 = vmatpush3.bf16.msra.mxu1 %v4049_v55  ;;  %v4061_v55 = vld [vmem:[%s4876_s1 + $0x1e8] sm:$0xff]  }
 0x667   : > { %3802 = vmatprep.subr.bf16.mxu1 %v4152_v0 }
 0x724   : > { %v1658_v58 = vpop.f32.mrb[36].mxu1 }
 0x725   : > { %v1664_v59 = vpack.c.bf16 %v1658_v58, %v1658_v58  ;;  %v3764_v60 = vpop.f32.mrb[37].mxu1  ;;  %v4066_v58 = vld [vmem:[%s4876_s1 + $0x210] sm:$0xff]  }
 0x726   : > { %v1661_v61 = vpop.f32.mrb[38].mxu1 }
 0x727   : > { %v3765_v62 = vpop.f32.mrb[39].mxu1  ;;  %3793 = vmatmul.mubr.msk.bf16.vlgmr.msra.gmra.mrb[44].mxu1 %vm1247_vm3, %v1664_v59  ;;  %v4067_v59 = vld [vmem:[%s4876_s1 + $0x218] sm:$0xff]  }
 0x728   : > { %3810 = vmatprep.mubr.msk.bf16.mxu1 %vm4153_vm0, %v4152_v0  ;;  %3803 = vmatpush3.bf16.msra.mxu1 %v4052_v7  ;;  %v3348_v7 = vld [vmem:[%s4877_s2 + $0x88] sm:$0x1] }
 0x729   : > { %3804 = vmatprep.subr.bf16.mxu1 %v4152_v0 }
 0x72c   : > { %v1713_v63 = vpop.f32.mrb[40].mxu1  ;;  %3805 = vmatpush3.bf16.msra.mxu1 %v4053_v8  ;;  %v3363_v8 = vld [vmem:[%s4877_s2 + $0x90] sm:$0x1] }
 0x72d   : > { %v1719_v1 = vpack.c.bf16 %v1713_v63, %v1713_v63  ;;  %v3770_v2 = vpop.f32.mrb[41].mxu1  ;;  %3806 = vmatprep.subr.bf16.mxu1 %v4152_v0 }
 0x72e   : > { %v1716_v3 = vpop.f32.mrb[42].mxu1 }
 0x72f   : > { %v3771_v4 = vpop.f32.mrb[43].mxu1  ;;  %3781 = vmatmul.mubr.msk.bf16.vlgmr.msra.gmra.mrb[52].mxu0 %vm1247_vm3, %v1719_v1 }
 0x730   : > { %3797 = vmatpush3.bf16.msra.mxu0 %v1622_v49  ;;  %3798 = vmatprep.mubr.msk.bf16.mxu0 %vm4153_vm0, %v4152_v0 }
 0x731   : > { %3814 = vmatprep.subr.bf16.mxu0 %v4152_v0  ;;  %3807 = vmatpush3.bf16.msra.mxu1 %v4054_v9  ;;  %v4068_v9 = vld [vmem:[%s4876_s1 + $0x220] sm:$0xff]  }
 0x732   : > { %3808 = vmatprep.subr.bf16.mxu1 %v4152_v0 }
 0x735   : > { %3809 = vmatpush3.bf16.msra.mxu1 %v4056_v11  ;;  %v4070_v11 = vld [vmem:[%s4876_s1 + $0x230] sm:$0xff]  }
 0x736   : > { %3832 = vmatprep.subr.bf16.mxu1 %v4152_v0 }
 0x737   : > { %3799 = vmatmul.mubr.msk.bf16.vlgmr.msra.gmra.mrb[56].mxu0 %vm1616_vm6, %v3287_v5 }
 0x738   : > { %3815 = vmatpush3.bf16.msra.mxu0 %v1622_v49  ;;  %3816 = vmatprep.mubr.msk.bf16.mxu0 %vm4153_vm0, %v4152_v0 }
 0x739   : > { %3820 = vmatprep.subr.bf16.mxu0 %v4152_v0 }
 0x73f   : > { %3817 = vmatmul.mubr.msk.bf16.vlgmr.msra.gmra.mrb[60].mxu0 %vm1616_vm6, %v3302_v6 }
 0x740   : > { %3828 = vmatprep.mubr.msk.bf16.mxu0 %vm4153_vm0, %v4152_v0  ;;  %3821 = vmatpush3.bf16.msra.mxu0 %v4055_v10  ;;  %v4069_v10 = vld [vmem:[%s4876_s1 + $0x228] sm:$0xff]  }
 0x741   : > { %3822 = vmatprep.subr.bf16.mxu0 %v4152_v0 }
 0x744   : > { %3823 = vmatpush3.bf16.msra.mxu0 %v4057_v12  ;;  %v4071_v12 = vld [vmem:[%s4876_s1 + $0x240] sm:$0xff]  }
 0x745   : > { %3824 = vmatprep.subr.bf16.mxu0 %v4152_v0 }
 0x748   : > { %3825 = vmatpush3.bf16.msra.mxu0 %v4058_v13  ;;  %v4072_v13 = vld [vmem:[%s4876_s1 + $0x238] sm:$0xff]  }
 0x749   : > { %3826 = vmatprep.subr.bf16.mxu0 %v4152_v0 }
 0x74c   : > { %3827 = vmatpush3.bf16.msra.mxu0 %v4059_v14  ;;  %v4073_v14 = vld [vmem:[%s4876_s1 + $0x248] sm:$0xff]  }
 0x74d   : > { %3844 = vmatprep.subr.bf16.mxu0 %v4152_v0 }
 0x7fa   : > { %v1857_v15 = vpop.f32.mrb[44].mxu1 }
 0x7fb   : > { %v3794_v16 = vpop.f32.mrb[45].mxu1 }
 0x7fc   : > { %v1860_v17 = vpop.f32.mrb[46].mxu1  ;;  %v4075_v16 = vld [vmem:[%s4876_s1 + $0x258] sm:$0xff]  }
 0x7fd   : > { %v3795_v18 = vpop.f32.mrb[47].mxu1 }
 0x802   : > { %v1790_v19 = vpop.f32.mrb[52].mxu0 }
 0x803   : > { %v1858_v20 = vadd.f32 %v1857_v15, %v1790_v19  ;;  %v3782_v21 = vpop.f32.mrb[53].mxu0  ;;  %v4074_v15 = vld [vmem:[%s4876_s1 + $0x250] sm:$0xff]  }
 0x804   : > { %v1793_v22 = vpop.f32.mrb[54].mxu0 }
 0x805   : > { %v3783_v23 = vpop.f32.mrb[55].mxu0 }
 0x80a   : > { %v1902_v24 = vpop.f32.mrb[56].mxu0 }
 0x80b   : > { %v1908_v25 = vpack.c.bf16 %v1902_v24, %v1902_v24  ;;  %v3800_v26 = vpop.f32.mrb[57].mxu0 }
 0x80c   : > { %v1905_v27 = vpop.f32.mrb[58].mxu0 }
 0x80d   : > { %v3801_v28 = vpop.f32.mrb[59].mxu0  ;;  %3811 = vmatmul.mubr.msk.bf16.vlgmr.msra.gmra.mrb[48].mxu1 %vm1247_vm3, %v1908_v25 }
 0x80e   : > { %3834 = vmatprep.mubr.msk.bf16.mxu1 %vm4153_vm0, %v4152_v0 }
 0x812   : > { %v2025_v29 = vpop.f32.mrb[60].mxu0 }
 0x813   : > { %v2031_v30 = vpack.c.bf16 %v2025_v29, %v2025_v29  ;;  %v3818_v31 = vpop.f32.mrb[61].mxu0 }
 0x814   : > { %v2028_v32 = vpop.f32.mrb[62].mxu0 }
 0x815   : > { %v3819_v33 = vpop.f32.mrb[63].mxu0  ;;  %3829 = vmatmul.mubr.msk.bf16.vlgmr.msra.gmra.mrb[64].mxu0 %vm1247_vm3, %v2031_v30  ;;  %v3378_v32 = vld [vmem:[%s4877_s2 + $0x98] sm:$0x1] }
 0x816   : > { %3852 = vmatprep.mubr.msk.bf16.mxu0 %vm4153_vm0, %v4152_v0  ;;  %3845 = vmatpush3.bf16.msra.mxu0 %v4062_v34 }
 0x817   : > { %3846 = vmatprep.subr.bf16.mxu0 %v4152_v0 }
 0x81a   : > { %3847 = vmatpush3.bf16.msra.mxu0 %v4064_v35 }
 0x81b   : > { %3848 = vmatprep.subr.bf16.mxu0 %v4152_v0 }
 0x81e   : > { %3849 = vmatpush3.bf16.msra.mxu0 %v4066_v58 }
 0x81f   : > { %3850 = vmatprep.subr.bf16.mxu0 %v4152_v0 }
 0x822   : > { %3851 = vmatpush3.bf16.msra.mxu0 %v4067_v59 }
 0x823   : > { %3868 = vmatprep.subr.bf16.mxu0 %v4152_v0 }
 0x8e0   : > { %v1979_v36 = vpop.f32.mrb[48].mxu1 }
 0x8e1   : > { %v1985_v37 = vadd.f32 %v1979_v36, %v1858_v20  ;;  %v3812_v38 = vpop.f32.mrb[49].mxu1 }
 0x8e2   : > { %v1982_v39 = vpop.f32.mrb[50].mxu1  ;;  %v4076_v38 = vld [vmem:[%s4876_s1 + $0x260] sm:$0xff]  }
 0x8e3   : > { %v3813_v40 = vpop.f32.mrb[51].mxu1  ;;  %v4077_v39 = vld [vmem:[%s4876_s1 + $0x268] sm:$0xff]  }
 0x8e4   : > { %v4078_v40 = vld [vmem:[%s4876_s1 + $0x280] sm:$0xff]  }
 0x8e8   : > { %v2102_v41 = vpop.f32.mrb[64].mxu0 }
 0x8e9   : > { %v2108_v43 = vadd.f32 %v2102_v41, %v1985_v37  ;;  %v3830_v44 = vpop.f32.mrb[65].mxu0  ;;  %v3388_v37 = vld [vmem:[%s4877_s2 + $0xa0] sm:$0x1]  ;;  %v4079_v41 = vld [vmem:[%s4876_s1 + $0x270] sm:$0xff]  }
 0x8ea   : > { %v2105_v45 = vpop.f32.mrb[66].mxu0  ;;  %v4082_v44 = vld [vmem:[%s4876_s1 + $0x290] sm:$0xff]  }
 0x8eb   : > { %v2114_v46 = vadd.f32 %v3317_v42, %v2108_v43  ;;  %v3831_v47 = vpop.f32.mrb[67].mxu0  ;;  %v4080_v42 = vld [vmem:[%s4876_s1 + $0x288] sm:$0xff]   ;;  %v4081_v43 = vld [vmem:[%s4876_s1 + $0x278] sm:$0xff]  }
 0x8ec   : > { %v4083_v45 = vld [vmem:[%s4876_s1 + $0x298] sm:$0xff]  }
 0x8ed   : > { %vm2115_vm7 = vcmp.gt.f32.partialorder %v2114_v46, 0.0  ;;  %v2116_v48 = vmul.f32 0.2, %v2114_v46 }
 0x8ef   : > { %v2117_v49 = vsel %vm2115_vm7, %v2114_v46, %v2116_v48 }
 0x8f0   : > { %v2118_v50 = vpack.c.bf16 %v2117_v49, %v2117_v49 }
 0x8f2   : > { %v4641_v51 = vsel %vm2125_vm8, %v2118_v50, 0 }
 0x8f3   : > { %3833 = vmatpush3.bf16.msra.mxu1 %v4641_v51 }
 0x8f4   : > { %3838 = vmatprep.subr.bf16.mxu1 %v4152_v0 }
 0x8f6   : > { %3835 = vmatmul.mubr.msk.bf16.vlgmr.msra.gmra.mrb[52].mxu1 %vm2121_vm9, %v3318_v52 }
 0x8f7   : > { %3839 = vmatpush3.bf16.msra.mxu1 %v4641_v51  ;;  %3840 = vmatprep.mubr.msk.bf16.mxu1 %vm4153_vm0, %v4152_v0 }
 0x8f8   : > { %3856 = vmatprep.subr.bf16.mxu1 %v4152_v0 }
 0x8fe   : > { %3841 = vmatmul.mubr.msk.bf16.vlgmr.msra.gmra.mrb[56].mxu1 %vm2121_vm9, %v3328_v53  ;;  %v2614_v53 = vld [vmem:[%s4878_s3 + $0x3] sm:$0x1] }
 0x8ff   : > { %3857 = vmatpush3.bf16.msra.mxu1 %v4060_v54  ;;  %3864 = vmatprep.mubr.msk.bf16.mxu1 %vm4153_vm0, %v4152_v0 }
 0x900   : > { %3858 = vmatprep.subr.bf16.mxu1 %v4152_v0 }
 0x903   : > { %3859 = vmatpush3.bf16.msra.mxu1 %v4061_v55 }
 0x904   : > { %3860 = vmatprep.subr.bf16.mxu1 %v4152_v0 }
 0x907   : > { %3861 = vmatpush3.bf16.msra.mxu1 %v4063_v56 }
 0x908   : > { %3862 = vmatprep.subr.bf16.mxu1 %v4152_v0 }
 0x90b   : > { %3863 = vmatpush3.bf16.msra.mxu1 %v4065_v57 }
 0x90c   : > { %3874 = vmatprep.subr.bf16.mxu1 %v4152_v0 }
 0x9c9   : > { %v2163_v60 = vpop.f32.mrb[52].mxu1 }
 0x9ca   : > { %v2169_v61 = vpack.c.bf16 %v2163_v60, %v2163_v60  ;;  %v3836_v62 = vpop.f32.mrb[53].mxu1 }
 0x9cb   : > { %v2166_v63 = vpop.f32.mrb[54].mxu1 }
 0x9cc   : > { %v3837_v1 = vpop.f32.mrb[55].mxu1  ;;  %3865 = vmatmul.mubr.msk.bf16.vlgmr.msra.gmra.mrb[60].mxu1 %vm1247_vm3, %v2169_v61 }
 0x9cd   : > { %3882 = vmatprep.mubr.msk.bf16.mxu1 %vm4153_vm0, %v4152_v0  ;;  %3875 = vmatpush3.bf16.msra.mxu1 %v4068_v9  ;;  %v4084_v9 = vld [vmem:[%s4876_s1 + $0x2a0] sm:$0xff]  }
 0x9ce   : > { %3876 = vmatprep.subr.bf16.mxu1 %v4152_v0 }
 0x9d1   : > { %v2218_v2 = vpop.f32.mrb[56].mxu1  ;;  %3877 = vmatpush3.bf16.msra.mxu1 %v4069_v10  ;;  %v4086_v10 = vld [vmem:[%s4876_s1 + $0x2b0] sm:$0xff]  }
 0x9d2   : > { %v2224_v3 = vpack.c.bf16 %v2218_v2, %v2218_v2  ;;  %v3842_v4 = vpop.f32.mrb[57].mxu1  ;;  %3878 = vmatprep.subr.bf16.mxu1 %v4152_v0 }
 0x9d3   : > { %v2221_v5 = vpop.f32.mrb[58].mxu1 }
 0x9d4   : > { %3853 = vmatmul.mubr.msk.bf16.vlgmr.msra.gmra.mrb[68].mxu0 %vm1247_vm3, %v2224_v3  ;;  %v3843_v6 = vpop.f32.mrb[59].mxu1 }
 0x9d5   : > { %3869 = vmatpush3.bf16.msra.mxu0 %v4641_v51  ;;  %3870 = vmatprep.mubr.msk.bf16.mxu0 %vm4153_vm0, %v4152_v0 }
 0x9d6   : > { %3886 = vmatprep.subr.bf16.mxu0 %v4152_v0  ;;  %3879 = vmatpush3.bf16.msra.mxu1 %v4070_v11  ;;  %v4087_v11 = vld [vmem:[%s4876_s1 + $0x2b8] sm:$0xff]  }
 0x9d7   : > { %3880 = vmatprep.subr.bf16.mxu1 %v4152_v0 }
 0x9da   : > { %3881 = vmatpush3.bf16.msra.mxu1 %v4072_v13 }
 0x9db   : > { %3904 = vmatprep.subr.bf16.mxu1 %v4152_v0 }
 0x9dc   : > { %3871 = vmatmul.mubr.msk.bf16.vlgmr.msra.gmra.mrb[72].mxu0 %vm2121_vm9, %v3348_v7 }
 0x9dd   : > { %3887 = vmatpush3.bf16.msra.mxu0 %v4641_v51  ;;  %3888 = vmatprep.mubr.msk.bf16.mxu0 %vm4153_vm0, %v4152_v0 }
 0x9de   : > { %3892 = vmatprep.subr.bf16.mxu0 %v4152_v0 }
 0x9e4   : > { %3889 = vmatmul.mubr.msk.bf16.vlgmr.msra.gmra.mrb[76].mxu0 %vm2121_vm9, %v3363_v8  ;;  %v3408_v8 = vld [vmem:[%s4877_s2 + $0xa8] sm:$0x1] }
 0x9e5   : > { %3900 = vmatprep.mubr.msk.bf16.mxu0 %vm4153_vm0, %v4152_v0  ;;  %3893 = vmatpush3.bf16.msra.mxu0 %v4071_v12 }
 0x9e6   : > { %3894 = vmatprep.subr.bf16.mxu0 %v4152_v0 }
 0x9e9   : > { %3895 = vmatpush3.bf16.msra.mxu0 %v4073_v14 }
 0x9ea   : > { %3896 = vmatprep.subr.bf16.mxu0 %v4152_v0 }
 0x9ed   : > { %3897 = vmatpush3.bf16.msra.mxu0 %v4074_v15 }
 0x9ee   : > { %3898 = vmatprep.subr.bf16.mxu0 %v4152_v0 }
 0x9f1   : > { %3899 = vmatpush3.bf16.msra.mxu0 %v4075_v16 }
 0x9f2   : > { %3916 = vmatprep.subr.bf16.mxu0 %v4152_v0 }
 0xa9f   : > { %v2362_v17 = vpop.f32.mrb[60].mxu1 }
 0xaa0   : > { %v3866_v18 = vpop.f32.mrb[61].mxu1 }
 0xaa1   : > { %v2365_v19 = vpop.f32.mrb[62].mxu1 }
 0xaa2   : > { %v3867_v20 = vpop.f32.mrb[63].mxu1 }
 0xaa7   : > { %v2295_v21 = vpop.f32.mrb[68].mxu0 }
 0xaa8   : > { %v2363_v22 = vadd.f32 %v2362_v17, %v2295_v21  ;;  %v3854_v23 = vpop.f32.mrb[69].mxu0 }
 0xaa9   : > { %v2298_v24 = vpop.f32.mrb[70].mxu0 }
 0xaaa   : > { %v3855_v25 = vpop.f32.mrb[71].mxu0 }
 0xaaf   : > { %v2407_v26 = vpop.f32.mrb[72].mxu0 }
 0xab0   : > { %v2413_v27 = vpack.c.bf16 %v2407_v26, %v2407_v26  ;;  %v3872_v28 = vpop.f32.mrb[73].mxu0  ;;  %v3423_v26 = vld [vmem:[%s4878_s3 + $0x4] ss:$0 sm:$0xff] }
 0xab1   : > { %v2410_v29 = vpop.f32.mrb[74].mxu0 }
 0xab2   : > { %3883 = vmatmul.mubr.msk.bf16.vlgmr.msra.gmra.mrb[64].mxu1 %vm1247_vm3, %v2413_v27  ;;  %v3873_v30 = vpop.f32.mrb[75].mxu0 }
 0xab3   : > { %3905 = vmatpush3.bf16.msra.mxu1 %v4641_v51  ;;  %3906 = vmatprep.mubr.msk.bf16.mxu1 %vm4153_vm0, %v4152_v0 }
 0xab4   : > { %3910 = vmatprep.subr.bf16.mxu1 %v4152_v0 }
 0xab7   : > { %v2530_v31 = vpop.f32.mrb[76].mxu0 }
 0xab8   : > { %v2536_v33 = vpack.c.bf16 %v2530_v31, %v2530_v31  ;;  %v3890_v34 = vpop.f32.mrb[77].mxu0 }
 0xab9   : > { %v2533_v35 = vpop.f32.mrb[78].mxu0 }
 0xaba   : > { %3901 = vmatmul.mubr.msk.bf16.vlgmr.msra.gmra.mrb[80].mxu0 %vm1247_vm3, %v2536_v33  ;;  %3907 = vmatmul.mubr.msk.bf16.vlgmr.msra.gmra.mrb[68].mxu1 %vm2121_vm9, %v3378_v32  ;;  %v3891_v36 = vpop.f32.mrb[79].mxu0 }
 0xabb   : > { %3911 = vmatpush3.bf16.msra.mxu1 %v4641_v51  ;;  %3912 = vmatprep.mubr.msk.bf16.mxu1 %vm4153_vm0, %v4152_v0 }
 0xabc   : > { %3928 = vmatprep.subr.bf16.mxu1 %v4152_v0  ;;  %3924 = vmatprep.mubr.msk.bf16.mxu0 %vm4153_vm0, %v4152_v0 }
 0xabd   : > { %3917 = vmatpush3.bf16.msra.mxu0 %v4078_v40 }
 0xabe   : > { %3918 = vmatprep.subr.bf16.mxu0 %v4152_v0 }
 0xac1   : > { %3919 = vmatpush3.bf16.msra.mxu0 %v4080_v42 }
 0xac2   : > { %3913 = vmatmul.mubr.msk.bf16.vlgmr.msra.gmra.mrb[72].mxu1 %vm2121_vm9, %v3388_v37  ;;  %3920 = vmatprep.subr.bf16.mxu0 %v4152_v0 }
 0xac3   : > { %3929 = vmatpush3.bf16.msra.mxu1 %v4076_v38  ;;  %3936 = vmatprep.mubr.msk.bf16.mxu1 %vm4153_vm0, %v4152_v0 }
 0xac4   : > { %3930 = vmatprep.subr.bf16.mxu1 %v4152_v0 }
 0xac5   : > { %3921 = vmatpush3.bf16.msra.mxu0 %v4082_v44 }
 0xac6   : > { %3922 = vmatprep.subr.bf16.mxu0 %v4152_v0 }
 0xac7   : > { %3931 = vmatpush3.bf16.msra.mxu1 %v4077_v39 }
 0xac8   : > { %3932 = vmatprep.subr.bf16.mxu1 %v4152_v0 }
 0xac9   : > { %3923 = vmatpush3.bf16.msra.mxu0 %v4083_v45 }
 0xaca   : > { %3940 = vmatprep.subr.bf16.mxu0 %v4152_v0 }
 0xacb   : > { %3933 = vmatpush3.bf16.msra.mxu1 %v4079_v41 }
 0xacc   : > { %3934 = vmatprep.subr.bf16.mxu1 %v4152_v0 }
 0xacf   : > { %3935 = vmatpush3.bf16.msra.mxu1 %v4081_v43 }
 0xad0   : > { %3946 = vmatprep.subr.bf16.mxu1 %v4152_v0 }
 0xb85   : > { %v2484_v46 = vpop.f32.mrb[64].mxu1 }
 0xb86   : > { %v2490_v47 = vadd.f32 %v2484_v46, %v2363_v22  ;;  %v3884_v48 = vpop.f32.mrb[65].mxu1 }
 0xb87   : > { %v2487_v49 = vpop.f32.mrb[66].mxu1 }
 0xb88   : > { %v3885_v50 = vpop.f32.mrb[67].mxu1 }
 0xb8d   : > { %v2607_v52 = vpop.f32.mrb[80].mxu0  ;;  %v2660_v54 = vpop.f32.mrb[68].mxu1 }
 0xb8e   : > { %v2613_v55 = vadd.f32 %v2607_v52, %v2490_v47  ;;  %v2666_v56 = vpack.c.bf16 %v2660_v54, %v2660_v54  ;;  %v3908_v57 = vpop.f32.mrb[69].mxu1  ;;  %v3902_v58 = vpop.f32.mrb[81].mxu0 }
 0xb8f   : > { %v2663_v59 = vpop.f32.mrb[70].mxu1  ;;  %v2610_v60 = vpop.f32.mrb[82].mxu0 }
 0xb90   : > { %v2615_v61 = vadd.f32 %v2614_v53, %v2613_v55  ;;  %v3909_v62 = vpop.f32.mrb[71].mxu1  ;;  %3937 = vmatmul.mubr.msk.bf16.vlgmr.msra.gmra.mrb[76].mxu1 %vm1247_vm3, %v2666_v56  ;;  %v3903_v63 = vpop.f32.mrb[83].mxu0 }
 0xb91   : > { %3954 = vmatprep.mubr.msk.bf16.mxu1 %vm4153_vm0, %v4152_v0  ;;  %3947 = vmatpush3.bf16.msra.mxu1 %v4084_v9 }
 0xb92   : > { %vm2616_vm10 = vcmp.gt.f32.partialorder %v2615_v61, 0.0  ;;  %v2617_v1 = vmul.f32 0.2, %v2615_v61  ;;  %3948 = vmatprep.subr.bf16.mxu1 %v4152_v0 }
 0xb94   : > { %v2618_v2 = vsel %vm2616_vm10, %v2615_v61, %v2617_v1 }
 0xb95   : > { %2620 = vst.msk [vmem:[%s231_s6] sm:$0x1] %vm2619_vm11, %v2618_v2  ;;  %v2715_v3 = vpop.f32.mrb[72].mxu1  ;;  %s223_s6 = scalar_lea.vmem [#allocation2], %s3101_s17 }
 0xb96   : > { %v2721_v4 = vpack.c.bf16 %v2715_v3, %v2715_v3  ;;  %v3914_v5 = vpop.f32.mrb[73].mxu1  ;;  %s3019_s7 = sshll.u32 %s223_s6, 4  ;;  %s4835_s7 = int_to_ptr.vmem [resolvable:$true] %s3019_s7 }
 0xb97   : > { %v2718_v6 = vpop.f32.mrb[74].mxu1  ;;  %s4088_s11 = scalar_lea.vmem %s4835_s7, 32  ;;  %p4095_p0 = scmp.lt.s32.totalorder %s4835_s7, %s4093_s12 }
 0xb98   : > { %3925 = vmatmul.mubr.msk.bf16.vlgmr.msra.gmra.mrb[84].mxu0 %vm1247_vm3, %v2721_v4  ;;  %v3915_v7 = vpop.f32.mrb[75].mxu1  ;;  %p4089_p11 = scmp.ne.s32.totalorder %s4835_s7, %s4088_s11  ;;  %p4096_p1 = scmp.lt.s32.totalorder %s4094_s13, %s4088_s11 }
 0xb99   : > { %3941 = vmatpush3.bf16.msra.mxu0 %v4641_v51  ;;  %3942 = vmatprep.mubr.msk.bf16.mxu0 %vm4153_vm0, %v4152_v0  ;;  %v4085_v51 = vld [vmem:[%s4876_s1 + $0x2a8] sm:$0xff]  }
 0xb9a   : > { %3949 = vmatpush3.bf16.msra.mxu1 %v4085_v51  ;;  %p4090_p12 = pnand %p4089_p11, %p4223_p5  ;;  %p4097_p2 = por %p4096_p1, %p4095_p0 }
 0xb9b   : > { %3950 = vmatprep.subr.bf16.mxu1 %v4152_v0 }
 0xb9c   : > { %p4091_p13 = pneg %p4090_p12 }
 0xb9e   : > { %3951 = vmatpush3.bf16.msra.mxu1 %v4086_v10  ;;  %p4098_p3 = pnand %p4097_p2, %p4091_p13 }
 0xb9f   : > { %3952 = vmatprep.subr.bf16.mxu1 %v4152_v0 }
 0xba0   : > { %3943 = vmatmul.mubr.msk.bf16.vlgmr.msra.gmra.mrb[88].mxu0 %vm2121_vm9, %v3408_v8 }
 0xba2   : > { %3953 = vmatpush3.bf16.msra.mxu1 %v4087_v11 }
 0xc63   : > { %v2859_v12 = vpop.f32.mrb[76].mxu1 }
 0xc64   : > { %v3938_v13 = vpop.f32.mrb[77].mxu1 }
 0xc65   : > { %v2862_v14 = vpop.f32.mrb[78].mxu1 }
 0xc66   : > { %v3939_v15 = vpop.f32.mrb[79].mxu1 }
 0xc6b   : > { %v2792_v16 = vpop.f32.mrb[84].mxu0 }
 0xc6c   : > { %v2860_v17 = vadd.f32 %v2859_v12, %v2792_v16  ;;  %v3926_v18 = vpop.f32.mrb[85].mxu0 }
 0xc6d   : > { %v2795_v19 = vpop.f32.mrb[86].mxu0 }
 0xc6e   : > { %v3927_v20 = vpop.f32.mrb[87].mxu0 }
 0xc73   : > { %v2904_v21 = vpop.f32.mrb[88].mxu0 }
 0xc74   : > { %v2910_v22 = vpack.c.bf16 %v2904_v21, %v2904_v21  ;;  %v3944_v23 = vpop.f32.mrb[89].mxu0 }
 0xc75   : > { %v2907_v0 = vpop.f32.mrb[90].mxu0 }
 0xc76   : > { %3955 = vmatmul.mubr.msk.bf16.vlgmr.msra.gmra.mrb[80].mxu1 %vm1247_vm3, %v2910_v22  ;;  %v3945_v24 = vpop.f32.mrb[91].mxu0 }
 0xd49   : > { %v2981_v25 = vpop.f32.mrb[80].mxu1 }
 0xd4a   : > { %v2987_v27 = vadd.f32 %v2981_v25, %v2860_v17  ;;  %v3956_v28 = vpop.f32.mrb[81].mxu1 }
 0xd4b   : > { %v2984_v29 = vpop.f32.mrb[82].mxu1 }
 0xd4c   : > { %v2993_v30 = vadd.f32 %v3423_v26, %v2987_v27  ;;  %v3957_v31 = vpop.f32.mrb[83].mxu1 }
 0xd4e   : > { %vm2994_vm12 = vcmp.gt.f32.partialorder %v2993_v30, 0.0  ;;  %v2995_v32 = vmul.f32 0.2, %v2993_v30 }
 0xd50   : > { %v2996_v33 = vsel %vm2994_vm12, %v2993_v30, %v2995_v32 }
 0xd51   : > { %2998 = vst.msk [vmem:[%s223_s6] sm:$0x3] %vm2997_vm13, %v2996_v33 }
 0xd52   : > { %4101 = shalt.err (!%p4098_p3)
}
 0xd53   : > { %s4102_s14 = scalar_lea.hbm %s4833_s9, 32  ;;  %s4106_s17 = scalar_lea.hbm %s4880_s5, 64 }
 0xd54   : > { %p4103_p4 = scmp.ne.s32.totalorder %s4833_s9, %s4102_s14  ;;  %p4107_p9 = scmp.lt.u32.totalorder %s4833_s9, %s4880_s5 }
 0xd55   : > { %p4108_p10 = scmp.lt.u32.totalorder %s4106_s17, %s4102_s14  ;;  %p4110_p12 = scmp.lt.u32.totalorder %s4102_s14, %s4833_s9 }
 0xd56   : > { %p4104_p7 = pnand %p4103_p4, %p4223_p5 }
 0xd57   : > { %p4109_p11 = por %p4108_p10, %p4107_p9 }
 0xd58   : > { %p4105_p8 = pneg %p4104_p7 }
 0xd59   : > { %p4111_p13 = por %p4110_p12, %p4109_p11 }
 0xd5b   : > { %p4112_p0 = pnand %p4111_p13, %p4105_p8 }
 0xd5d   : > { %4115 = shalt.err (!%p4112_p0)
}
 0xd5e   : > { %3958 = dma.vmem_to_hbm [thread:$0]  (%p4223_p5), %s4835_s7, 32, %s4833_s9, %s3003_s10  }
 0xd5f PF: > { %p3964_p1 = scmp.ge.s32.totalorder %s4150_s21, 2  ;;  %s3037_s26 = sand.u32 1, %s4138_s18  }
 0xd60   : > { %s3038_s6 = scalar_lea.sflag [#allocation3], %s3037_s26 }
 0xd61   : > { %p3961_p2 = pnand %p3964_p1, %p4227_p6 }
 0xd63   : > { %4133 = dma.done.wait (!%p3961_p2), %s3038_s6, 32  }
 0xd64   : > { %4135 = vsyncadd (!%p3961_p2), %s3038_s6, 4294967264  ;;  %p16_p3 = scmp.ge.s32.totalorder %s4210_s24, 4   ;;  %s4883_s18 = smov %s4142_s19 }
 0xd65   : > { %s4884_s19 = smov %s4146_s20  ;;  %s4885_s20 = smov %s4221_s27 }
 0xd66   : > { %s4886_s21 = smov %s4210_s24  ;;  %18 = sbr.rel (!%p16_p3) target bundleno = 3 (0x3), region = 125 }
 0xd6d   :  { %3043 = vsyncpa [#allocation3], 1 }
 0xd6e   :  { %3045 = vsyncpa [#allocation3 + $0x1], 1 }

</bundles_post_ra>
